<compile_context>
chip_gen: v5e
topology: v5e:2x2
jax: 0.10.0
libtpu: 0.0.40
codegen_flags: <defaults>
</compile_context>

<pallas_src>
import jax
import jax.numpy as jnp
from jax.experimental import pallas as pl
from jax.experimental.pallas import tpu as pltpu

HIDDEN = 20
NUM_CLASSES = 2
GATE_STRIDE = 128     # lane-aligned gate slab stride (one 128-lane block per gate)
TB_MAX = 512          # max padded batch rows per grid program


def _round_up(x, m):
    return ((x + m - 1) // m) * m


def _make_gru_cll_kernel(seq_len, tb, feat, hidden, n_classes):
    """Build the kernel with static seq_len / batch-tile / feature / hidden sizes."""
    H, C, G = hidden, n_classes, GATE_STRIDE
    # Off-chain dots (input projection, FC): f32-faithful; extra MXU passes are
    # hidden in the prologue/epilogue.
    HI_PREC = jax.lax.Precision.HIGHEST
    # Per-step hidden dot sits on the serial recurrence chain: keep the single
    # bf16 MXU pass.  Switch to HIGHEST if bit-closeness to the fp32 PyTorch GRU
    # matters more than per-step latency.
    REC_PREC = jax.lax.Precision.DEFAULT

    def kernel(x_ref,      # (S, tb, F)   time-major input block
               wi_ref,     # (F, 3G)      input weights, gate g at cols [g*G, g*G+H)
               whfc_ref,   # (H, 4G)      hidden weights (cols 0:3G, gate layout) | fc weights at col 3G
               bias_ref,   # (1, 5G)      [b_i r|z|n (gate layout) | b_hn @3G | b_fc @4G]
               out_ref,    # (tb, C)
               gi_scr):    # (S*tb, 3G)   VMEM scratch for the hoisted input projection
        # ---- all S*tb input-gate projections in ONE batched MXU matmul, staged
        #      to VMEM scratch so the recurrence never keeps them live in vregs.
        x2 = x_ref[...].reshape(seq_len * tb, feat)
        gi_scr[...] = (
            jnp.dot(x2, wi_ref[...], preferred_element_type=jnp.float32,
                    precision=HI_PREC)
            + bias_ref[:, 0:3 * G])                                  # (S*tb, 3G)

        wh = whfc_ref[:, 0:3 * G]                                    # (H, 3G)
        wfc = whfc_ref[:, 3 * G:3 * G + C]                           # (H, C)
        bhn = jnp.broadcast_to(bias_ref[:, 3 * G:3 * G + H], (tb, H))  # hoisted
        bfc = bias_ref[:, 4 * G:4 * G + C]                           # (1, C)

        # ---- recurrence: h carried in vregs, one fused (tb,H)x(H,3G) MXU dot
        #      per step; every gate slice starts on a 128-lane boundary.
        def step(t, h):
            row0 = pl.multiple_of(t * tb, tb)                        # sublane-aligned
            gi = gi_scr[pl.ds(row0, tb), :]                          # (tb, 3G)
            gh = jnp.dot(h, wh, preferred_element_type=jnp.float32,
                         precision=REC_PREC)                         # (tb, 3G)
            r = jax.nn.sigmoid(gi[:, 0:H] + gh[:, 0:H])
            z = jax.nn.sigmoid(gi[:, G:G + H] + gh[:, G:G + H])
            n = jnp.tanh(gi[:, 2 * G:2 * G + H]
                         + r * (gh[:, 2 * G:2 * G + H] + bhn))
            return n + z * (h - n)                                   # == (1-z)*n + z*h

        h = jax.lax.fori_loop(0, seq_len, step,
                              jnp.zeros((tb, H), jnp.float32), unroll=True)

        # ---- epilogue: tanh -> Linear -> stable log_softmax(dim=1)
        ht = jnp.tanh(h)                                             # (tb, H)
        logits = (jnp.dot(ht, wfc, preferred_element_type=jnp.float32,
                          precision=HI_PREC) + bfc)                  # (tb, C)
        m = jnp.max(logits, axis=1, keepdims=True)
        shifted = logits - m
        lse = jnp.log(jnp.sum(jnp.exp(shifted), axis=1, keepdims=True))
        out_ref[...] = shifted - lse

    return kernel


def _gate_lane_pad(w, hidden):
    """(rows, 3H) with columns r|z|n  ->  (rows, 3*G), gate g at cols [g*G, g*G+H)."""
    rows = w.shape[0]
    H, G = hidden, GATE_STRIDE
    out = jnp.zeros((rows, 3 * G), jnp.float32)
    for g in range(3):
        out = out.at[:, g * G:g * G + H].set(w[:, g * H:(g + 1) * H])
    return out


def gru_cll_forward(x, onehot_idx, params):
    """x: (B, S, R) float32; onehot_idx: (B, S, n_fields) int32.  Returns (B, 2)."""
    H, C, G = HIDDEN, NUM_CLASSES, GATE_STRIDE
    B, S, _ = x.shape

    # --- glue: per-field embedding lookup + concat (OnehotEmbedding) ---
    embs = [jnp.take(tbl, onehot_idx[..., i], axis=0)
            for i, tbl in enumerate(params["emb_tables"])]
    x_cat = jnp.concatenate([x] + embs, axis=-1).astype(jnp.float32)   # (B, S, F)
    F = x_cat.shape[-1]

    # --- batch tiling: large blocks (amortize the serial recurrence and grid
    #     overhead), grid over batch so v7x's second TensorCore gets work.
    tb = min(TB_MAX, _round_up(B, 8))
    Bp = _round_up(B, tb)
    nb = Bp // tb

    # time-major + batch pad (padded rows run on zeros, sliced off at the end).
    # TODO(synk): for large B, fold this transpose/pad into the BlockSpec
    #             index_map instead of an XLA relayout of the dominant array.
    x_tm = jnp.transpose(x_cat, (1, 0, 2))                             # (S, B, F)
    x_pad = jnp.pad(x_tm, ((0, 0), (0, Bp - B), (0, 0)))               # (S, Bp, F)

    # --- glue: fuse + lane-align weights (PyTorch gate order along rows: r, z, n) ---
    w_ih, w_hh = params["w_ih"], params["w_hh"]        # (3H, F), (3H, H)
    b_ih, b_hh = params["b_ih"], params["b_hh"]        # (3H,), (3H,)
    wi = _gate_lane_pad(jnp.transpose(w_ih), H)        # (F, 3G)
    wh = _gate_lane_pad(jnp.transpose(w_hh), H)        # (H, 3G)
    wfc = jnp.transpose(params["w_fc"])                # (H, C)
    whfc = jnp.concatenate(
        [wh, jnp.pad(wfc, ((0, 0), (0, G - C)))], axis=1)              # (H, 4G)

    bi = jnp.concatenate([b_ih[0:2 * H] + b_hh[0:2 * H],   # r, z: combined biases
                          b_ih[2 * H:3 * H]])              # n: input-side bias only
    bias = jnp.concatenate(
        [_gate_lane_pad(bi.reshape(1, 3 * H), H),                                  # (1, 3G)
         jnp.pad(b_hh[2 * H:3 * H].reshape(1, H), ((0, 0), (0, G - H))),           # b_hn
         jnp.pad(params["b_fc"].reshape(1, C).astype(jnp.float32),
                 ((0, 0), (0, G - C)))],                                           # b_fc
        axis=1)                                                        # (1, 5G)

    kernel = _make_gru_cll_kernel(S, tb, F, H, C)

    out = pl.pallas_call(
        kernel,
        out_shape=jax.ShapeDtypeStruct((Bp, C), jnp.float32),
        grid=(nb,),
        in_specs=[
            pl.BlockSpec((S, tb, F), lambda b: (0, b, 0)),
            pl.BlockSpec((F, 3 * G), lambda b: (0, 0)),
            pl.BlockSpec((H, 4 * G), lambda b: (0, 0)),
            pl.BlockSpec((1, 5 * G), lambda b: (0, 0)),
        ],
        out_specs=pl.BlockSpec((tb, C), lambda b: (b, 0)),
        scratch_shapes=[pltpu.VMEM((S * tb, 3 * G), jnp.float32)],
        compiler_params=pltpu.CompilerParams(
            dimension_semantics=("parallel",),
            # explicit budget: within v5e's 128 MiB / v7x's 64 MiB physical VMEM,
            # and raises v5e's 16 MiB scoped default so the max tile still fits.
            vmem_limit_bytes=32 * 1024 * 1024,
        ),
    )(x_pad, wi, whfc, bias)
    return out[:B]


def make_params(key, input_record_width, cards, emb_dims):
    """Deterministic synthetic parameter init (no checkpoint load)."""
    H = HIDDEN
    feat = input_record_width + sum(emb_dims)
    keys = jax.random.split(key, 8 + len(cards))
    params = {
        "emb_tables": [
            0.1 * jax.random.normal(keys[i], (cards[i], emb_dims[i]), jnp.float32)
            for i in range(len(cards))
        ],
        "w_ih": 0.1 * jax.random.normal(keys[-8], (3 * H, feat), jnp.float32),
        "w_hh": 0.1 * jax.random.normal(keys[-7], (3 * H, H), jnp.float32),
        "b_ih": 0.1 * jax.random.normal(keys[-6], (3 * H,), jnp.float32),
        "b_hh": 0.1 * jax.random.normal(keys[-5], (3 * H,), jnp.float32),
        "w_fc": 0.1 * jax.random.normal(keys[-4], (NUM_CLASSES, H), jnp.float32),
        "b_fc": 0.1 * jax.random.normal(keys[-3], (NUM_CLASSES,), jnp.float32),
    }
    return params


if __name__ == "__main__":
    key = jax.random.PRNGKey(0)
    B, S, R = 2, 8, 4                       # batch, sequence, record width
    cards = [5, 7]                          # onehot field cardinalities
    emb_dims = [3, 3]                       # embedding dim per onehot field

    k_x, k_o1, k_o2, k_p = jax.random.split(key, 4)
    x = jax.random.normal(k_x, (B, S, R), jnp.float32)
    onehot_idx = jnp.stack(
        [jax.random.randint(k_o1, (B, S), 0, cards[0]),
         jax.random.randint(k_o2, (B, S), 0, cards[1])],
        axis=-1).astype(jnp.int32)          # (B, S, n_fields)

    params = make_params(k_p, R, cards, emb_dims)

    out = gru_cll_forward(x, onehot_idx, params)
    jax.block_until_ready(out)
    assert out.shape == (B, NUM_CLASSES)
    print("KERNEL_OK")
</pallas_src>

<mosaic_0001>
module attributes {stable_mosaic.version = 11 : i64} {
  func.func @kernel(%arg0: i32, %arg1: memref<8x8x10xf32, #tpu.memory_space<vmem>>, %arg2: memref<10x384xf32, #tpu.memory_space<vmem>>, %arg3: memref<20x512xf32, #tpu.memory_space<vmem>>, %arg4: memref<1x640xf32, #tpu.memory_space<vmem>>, %arg5: memref<8x2xf32, #tpu.memory_space<vmem>>, %arg6: memref<64x384xf32, #tpu.memory_space<vmem>>) attributes {dimension_semantics = [#tpu.dimension_semantics<parallel>], iteration_bounds = array<i64: 1>, scalar_prefetch = 0 : i64, scratch_operands = 1 : i64, tpu.core_type = #tpu.core_type<tc>, window_params = [{transform_indices = @transform_0, window_bounds = array<i64: 8, 8, 10>}, {pipeline_mode = #tpu.pipeline_mode<synchronous>, transform_indices = @transform_1, window_bounds = array<i64: 10, 384>}, {pipeline_mode = #tpu.pipeline_mode<synchronous>, transform_indices = @transform_2, window_bounds = array<i64: 20, 512>}, {pipeline_mode = #tpu.pipeline_mode<synchronous>, transform_indices = @transform_3, window_bounds = array<i64: 1, 640>}, {transform_indices = @transform_4, window_bounds = array<i64: 8, 2>}]} {
    %c0 = arith.constant 0 : index
    %c0_0 = arith.constant 0 : index
    %c0_1 = arith.constant 0 : index
    %0 = vector.load %arg1[%c0, %c0_0, %c0_1] : memref<8x8x10xf32, #tpu.memory_space<vmem>>, vector<8x8x10xf32>
    %1 = vector.shape_cast %0 : vector<8x8x10xf32> to vector<64x10xf32>
    %c0_2 = arith.constant 0 : index
    %c0_3 = arith.constant 0 : index
    %2 = vector.load %arg2[%c0_2, %c0_3] : memref<10x384xf32, #tpu.memory_space<vmem>>, vector<10x384xf32>
    %cst = arith.constant dense<0.000000e+00> : vector<64x384xf32>
    %3 = tpu.matmul %1, %2, %cst {dimension_numbers = #tpu.dot_dimension_numbers<[1], [0], [0], [1], [0, 0, 1, 1], [], []>, precision = #tpu.contract_precision<fp32>} : vector<64x10xf32>, vector<10x384xf32>, vector<64x384xf32> -> vector<64x384xf32>
    %c0_4 = arith.constant 0 : index
    %c0_5 = arith.constant 0 : index
    %4 = vector.load %arg4[%c0_4, %c0_5] : memref<1x640xf32, #tpu.memory_space<vmem>>, vector<1x384xf32>
    %5 = vector.broadcast %4 : vector<1x384xf32> to vector<64x384xf32>
    %6 = arith.addf %3, %5 : vector<64x384xf32>
    %c0_6 = arith.constant 0 : index
    %c0_7 = arith.constant 0 : index
    %7 = vector.load %arg6[%c0_6, %c0_7] : memref<64x384xf32, #tpu.memory_space<vmem>>, vector<64x384xf32>
    tpu.vector_store %arg6[%c0_6, %c0_7], %6 {strides = array<i32>} : memref<64x384xf32, #tpu.memory_space<vmem>>, vector<64x384xf32>,
    %c0_8 = arith.constant 0 : index
    %c0_9 = arith.constant 0 : index
    %8 = vector.load %arg3[%c0_8, %c0_9] : memref<20x512xf32, #tpu.memory_space<vmem>>, vector<20x384xf32>
    %c0_10 = arith.constant 0 : index
    %c384 = arith.constant 384 : index
    %9 = vector.load %arg3[%c0_10, %c384] : memref<20x512xf32, #tpu.memory_space<vmem>>, vector<20x2xf32>
    %c0_11 = arith.constant 0 : index
    %c384_12 = arith.constant 384 : index
    %10 = vector.load %arg4[%c0_11, %c384_12] : memref<1x640xf32, #tpu.memory_space<vmem>>, vector<1x20xf32>
    %11 = vector.shape_cast %10 : vector<1x20xf32> to vector<1x20xf32>
    %12 = vector.broadcast %11 : vector<1x20xf32> to vector<8x20xf32>
    %c0_13 = arith.constant 0 : index
    %c512 = arith.constant 512 : index
    %13 = vector.load %arg4[%c0_13, %c512] : memref<1x640xf32, #tpu.memory_space<vmem>>, vector<1x2xf32>
    %cst_14 = arith.constant 0.000000e+00 : f32
    %14 = vector.broadcast %cst_14 : f32 to vector<8x20xf32>
    %c0_i32 = arith.constant 0 : i32
    %c8_i32 = arith.constant 8 : i32
    %15 = arith.muli %c0_i32, %c8_i32 : i32
    %16 = tpu.assume_multiple %15, 8 : i32
    %17 = arith.index_cast %16 : i32 to index
    %c0_15 = arith.constant 0 : index
    %18 = vector.load %arg6[%17, %c0_15] : memref<64x384xf32, #tpu.memory_space<vmem>>, vector<8x384xf32>
    %cst_16 = arith.constant dense<0.000000e+00> : vector<8x384xf32>
    %19 = tpu.matmul %14, %8, %cst_16 {dimension_numbers = #tpu.dot_dimension_numbers<[1], [0], [0], [1], [0, 0, 1, 1], [], []>} : vector<8x20xf32>, vector<20x384xf32>, vector<8x384xf32> -> vector<8x384xf32>
    %20 = vector.extract_strided_slice %18 {offsets = [0, 0], sizes = [8, 20], strides = [1, 1]} : vector<8x384xf32> to vector<8x20xf32>
    %21 = vector.extract_strided_slice %19 {offsets = [0, 0], sizes = [8, 20], strides = [1, 1]} : vector<8x384xf32> to vector<8x20xf32>
    %22 = arith.addf %20, %21 : vector<8x20xf32>
    %23 = arith.negf %22 : vector<8x20xf32>
    %24 = math.exp %23 : vector<8x20xf32>
    %cst_17 = arith.constant 1.000000e+00 : f32
    %25 = vector.broadcast %cst_17 : f32 to vector<8x20xf32>
    %26 = arith.addf %25, %24 : vector<8x20xf32>
    %27 = arith.divf %25, %26 : vector<8x20xf32>
    %28 = vector.extract_strided_slice %18 {offsets = [0, 128], sizes = [8, 20], strides = [1, 1]} : vector<8x384xf32> to vector<8x20xf32>
    %29 = vector.extract_strided_slice %19 {offsets = [0, 128], sizes = [8, 20], strides = [1, 1]} : vector<8x384xf32> to vector<8x20xf32>
    %30 = arith.addf %28, %29 : vector<8x20xf32>
    %31 = arith.negf %30 : vector<8x20xf32>
    %32 = math.exp %31 : vector<8x20xf32>
    %cst_18 = arith.constant 1.000000e+00 : f32
    %33 = vector.broadcast %cst_18 : f32 to vector<8x20xf32>
    %34 = arith.addf %33, %32 : vector<8x20xf32>
    %35 = arith.divf %33, %34 : vector<8x20xf32>
    %36 = vector.extract_strided_slice %18 {offsets = [0, 256], sizes = [8, 20], strides = [1, 1]} : vector<8x384xf32> to vector<8x20xf32>
    %37 = vector.extract_strided_slice %19 {offsets = [0, 256], sizes = [8, 20], strides = [1, 1]} : vector<8x384xf32> to vector<8x20xf32>
    %38 = arith.addf %37, %12 : vector<8x20xf32>
    %39 = arith.mulf %27, %38 : vector<8x20xf32>
    %40 = arith.addf %36, %39 : vector<8x20xf32>
    %41 = math.tanh %40 : vector<8x20xf32>
    %42 = arith.subf %14, %41 : vector<8x20xf32>
    %43 = arith.mulf %35, %42 : vector<8x20xf32>
    %44 = arith.addf %41, %43 : vector<8x20xf32>
    %c1_i32 = arith.constant 1 : i32
    %c8_i32_19 = arith.constant 8 : i32
    %45 = arith.muli %c1_i32, %c8_i32_19 : i32
    %46 = tpu.assume_multiple %45, 8 : i32
    %47 = arith.index_cast %46 : i32 to index
    %c0_20 = arith.constant 0 : index
    %48 = vector.load %arg6[%47, %c0_20] : memref<64x384xf32, #tpu.memory_space<vmem>>, vector<8x384xf32>
    %cst_21 = arith.constant dense<0.000000e+00> : vector<8x384xf32>
    %49 = tpu.matmul %44, %8, %cst_21 {dimension_numbers = #tpu.dot_dimension_numbers<[1], [0], [0], [1], [0, 0, 1, 1], [], []>} : vector<8x20xf32>, vector<20x384xf32>, vector<8x384xf32> -> vector<8x384xf32>
    %50 = vector.extract_strided_slice %48 {offsets = [0, 0], sizes = [8, 20], strides = [1, 1]} : vector<8x384xf32> to vector<8x20xf32>
    %51 = vector.extract_strided_slice %49 {offsets = [0, 0], sizes = [8, 20], strides = [1, 1]} : vector<8x384xf32> to vector<8x20xf32>
    %52 = arith.addf %50, %51 : vector<8x20xf32>
    %53 = arith.negf %52 : vector<8x20xf32>
    %54 = math.exp %53 : vector<8x20xf32>
    %cst_22 = arith.constant 1.000000e+00 : f32
    %55 = vector.broadcast %cst_22 : f32 to vector<8x20xf32>
    %56 = arith.addf %55, %54 : vector<8x20xf32>
    %57 = arith.divf %55, %56 : vector<8x20xf32>
    %58 = vector.extract_strided_slice %48 {offsets = [0, 128], sizes = [8, 20], strides = [1, 1]} : vector<8x384xf32> to vector<8x20xf32>
    %59 = vector.extract_strided_slice %49 {offsets = [0, 128], sizes = [8, 20], strides = [1, 1]} : vector<8x384xf32> to vector<8x20xf32>
    %60 = arith.addf %58, %59 : vector<8x20xf32>
    %61 = arith.negf %60 : vector<8x20xf32>
    %62 = math.exp %61 : vector<8x20xf32>
    %cst_23 = arith.constant 1.000000e+00 : f32
    %63 = vector.broadcast %cst_23 : f32 to vector<8x20xf32>
    %64 = arith.addf %63, %62 : vector<8x20xf32>
    %65 = arith.divf %63, %64 : vector<8x20xf32>
    %66 = vector.extract_strided_slice %48 {offsets = [0, 256], sizes = [8, 20], strides = [1, 1]} : vector<8x384xf32> to vector<8x20xf32>
    %67 = vector.extract_strided_slice %49 {offsets = [0, 256], sizes = [8, 20], strides = [1, 1]} : vector<8x384xf32> to vector<8x20xf32>
    %68 = arith.addf %67, %12 : vector<8x20xf32>
    %69 = arith.mulf %57, %68 : vector<8x20xf32>
    %70 = arith.addf %66, %69 : vector<8x20xf32>
    %71 = math.tanh %70 : vector<8x20xf32>
    %72 = arith.subf %44, %71 : vector<8x20xf32>
    %73 = arith.mulf %65, %72 : vector<8x20xf32>
    %74 = arith.addf %71, %73 : vector<8x20xf32>
    %c2_i32 = arith.constant 2 : i32
    %c8_i32_24 = arith.constant 8 : i32
    %75 = arith.muli %c2_i32, %c8_i32_24 : i32
    %76 = tpu.assume_multiple %75, 8 : i32
    %77 = arith.index_cast %76 : i32 to index
    %c0_25 = arith.constant 0 : index
    %78 = vector.load %arg6[%77, %c0_25] : memref<64x384xf32, #tpu.memory_space<vmem>>, vector<8x384xf32>
    %cst_26 = arith.constant dense<0.000000e+00> : vector<8x384xf32>
    %79 = tpu.matmul %74, %8, %cst_26 {dimension_numbers = #tpu.dot_dimension_numbers<[1], [0], [0], [1], [0, 0, 1, 1], [], []>} : vector<8x20xf32>, vector<20x384xf32>, vector<8x384xf32> -> vector<8x384xf32>
    %80 = vector.extract_strided_slice %78 {offsets = [0, 0], sizes = [8, 20], strides = [1, 1]} : vector<8x384xf32> to vector<8x20xf32>
    %81 = vector.extract_strided_slice %79 {offsets = [0, 0], sizes = [8, 20], strides = [1, 1]} : vector<8x384xf32> to vector<8x20xf32>
    %82 = arith.addf %80, %81 : vector<8x20xf32>
    %83 = arith.negf %82 : vector<8x20xf32>
    %84 = math.exp %83 : vector<8x20xf32>
    %cst_27 = arith.constant 1.000000e+00 : f32
    %85 = vector.broadcast %cst_27 : f32 to vector<8x20xf32>
    %86 = arith.addf %85, %84 : vector<8x20xf32>
    %87 = arith.divf %85, %86 : vector<8x20xf32>
    %88 = vector.extract_strided_slice %78 {offsets = [0, 128], sizes = [8, 20], strides = [1, 1]} : vector<8x384xf32> to vector<8x20xf32>
    %89 = vector.extract_strided_slice %79 {offsets = [0, 128], sizes = [8, 20], strides = [1, 1]} : vector<8x384xf32> to vector<8x20xf32>
    %90 = arith.addf %88, %89 : vector<8x20xf32>
    %91 = arith.negf %90 : vector<8x20xf32>
    %92 = math.exp %91 : vector<8x20xf32>
    %cst_28 = arith.constant 1.000000e+00 : f32
    %93 = vector.broadcast %cst_28 : f32 to vector<8x20xf32>
    %94 = arith.addf %93, %92 : vector<8x20xf32>
    %95 = arith.divf %93, %94 : vector<8x20xf32>
    %96 = vector.extract_strided_slice %78 {offsets = [0, 256], sizes = [8, 20], strides = [1, 1]} : vector<8x384xf32> to vector<8x20xf32>
    %97 = vector.extract_strided_slice %79 {offsets = [0, 256], sizes = [8, 20], strides = [1, 1]} : vector<8x384xf32> to vector<8x20xf32>
    %98 = arith.addf %97, %12 : vector<8x20xf32>
    %99 = arith.mulf %87, %98 : vector<8x20xf32>
    %100 = arith.addf %96, %99 : vector<8x20xf32>
    %101 = math.tanh %100 : vector<8x20xf32>
    %102 = arith.subf %74, %101 : vector<8x20xf32>
    %103 = arith.mulf %95, %102 : vector<8x20xf32>
    %104 = arith.addf %101, %103 : vector<8x20xf32>
    %c3_i32 = arith.constant 3 : i32
    %c8_i32_29 = arith.constant 8 : i32
    %105 = arith.muli %c3_i32, %c8_i32_29 : i32
    %106 = tpu.assume_multiple %105, 8 : i32
    %107 = arith.index_cast %106 : i32 to index
    %c0_30 = arith.constant 0 : index
    %108 = vector.load %arg6[%107, %c0_30] : memref<64x384xf32, #tpu.memory_space<vmem>>, vector<8x384xf32>
    %cst_31 = arith.constant dense<0.000000e+00> : vector<8x384xf32>
    %109 = tpu.matmul %104, %8, %cst_31 {dimension_numbers = #tpu.dot_dimension_numbers<[1], [0], [0], [1], [0, 0, 1, 1], [], []>} : vector<8x20xf32>, vector<20x384xf32>, vector<8x384xf32> -> vector<8x384xf32>
    %110 = vector.extract_strided_slice %108 {offsets = [0, 0], sizes = [8, 20], strides = [1, 1]} : vector<8x384xf32> to vector<8x20xf32>
    %111 = vector.extract_strided_slice %109 {offsets = [0, 0], sizes = [8, 20], strides = [1, 1]} : vector<8x384xf32> to vector<8x20xf32>
    %112 = arith.addf %110, %111 : vector<8x20xf32>
    %113 = arith.negf %112 : vector<8x20xf32>
    %114 = math.exp %113 : vector<8x20xf32>
    %cst_32 = arith.constant 1.000000e+00 : f32
    %115 = vector.broadcast %cst_32 : f32 to vector<8x20xf32>
    %116 = arith.addf %115, %114 : vector<8x20xf32>
    %117 = arith.divf %115, %116 : vector<8x20xf32>
    %118 = vector.extract_strided_slice %108 {offsets = [0, 128], sizes = [8, 20], strides = [1, 1]} : vector<8x384xf32> to vector<8x20xf32>
    %119 = vector.extract_strided_slice %109 {offsets = [0, 128], sizes = [8, 20], strides = [1, 1]} : vector<8x384xf32> to vector<8x20xf32>
    %120 = arith.addf %118, %119 : vector<8x20xf32>
    %121 = arith.negf %120 : vector<8x20xf32>
    %122 = math.exp %121 : vector<8x20xf32>
    %cst_33 = arith.constant 1.000000e+00 : f32
    %123 = vector.broadcast %cst_33 : f32 to vector<8x20xf32>
    %124 = arith.addf %123, %122 : vector<8x20xf32>
    %125 = arith.divf %123, %124 : vector<8x20xf32>
    %126 = vector.extract_strided_slice %108 {offsets = [0, 256], sizes = [8, 20], strides = [1, 1]} : vector<8x384xf32> to vector<8x20xf32>
    %127 = vector.extract_strided_slice %109 {offsets = [0, 256], sizes = [8, 20], strides = [1, 1]} : vector<8x384xf32> to vector<8x20xf32>
    %128 = arith.addf %127, %12 : vector<8x20xf32>
    %129 = arith.mulf %117, %128 : vector<8x20xf32>
    %130 = arith.addf %126, %129 : vector<8x20xf32>
    %131 = math.tanh %130 : vector<8x20xf32>
    %132 = arith.subf %104, %131 : vector<8x20xf32>
    %133 = arith.mulf %125, %132 : vector<8x20xf32>
    %134 = arith.addf %131, %133 : vector<8x20xf32>
    %c4_i32 = arith.constant 4 : i32
    %c8_i32_34 = arith.constant 8 : i32
    %135 = arith.muli %c4_i32, %c8_i32_34 : i32
    %136 = tpu.assume_multiple %135, 8 : i32
    %137 = arith.index_cast %136 : i32 to index
    %c0_35 = arith.constant 0 : index
    %138 = vector.load %arg6[%137, %c0_35] : memref<64x384xf32, #tpu.memory_space<vmem>>, vector<8x384xf32>
    %cst_36 = arith.constant dense<0.000000e+00> : vector<8x384xf32>
    %139 = tpu.matmul %134, %8, %cst_36 {dimension_numbers = #tpu.dot_dimension_numbers<[1], [0], [0], [1], [0, 0, 1, 1], [], []>} : vector<8x20xf32>, vector<20x384xf32>, vector<8x384xf32> -> vector<8x384xf32>
    %140 = vector.extract_strided_slice %138 {offsets = [0, 0], sizes = [8, 20], strides = [1, 1]} : vector<8x384xf32> to vector<8x20xf32>
    %141 = vector.extract_strided_slice %139 {offsets = [0, 0], sizes = [8, 20], strides = [1, 1]} : vector<8x384xf32> to vector<8x20xf32>
    %142 = arith.addf %140, %141 : vector<8x20xf32>
    %143 = arith.negf %142 : vector<8x20xf32>
    %144 = math.exp %143 : vector<8x20xf32>
    %cst_37 = arith.constant 1.000000e+00 : f32
    %145 = vector.broadcast %cst_37 : f32 to vector<8x20xf32>
    %146 = arith.addf %145, %144 : vector<8x20xf32>
    %147 = arith.divf %145, %146 : vector<8x20xf32>
    %148 = vector.extract_strided_slice %138 {offsets = [0, 128], sizes = [8, 20], strides = [1, 1]} : vector<8x384xf32> to vector<8x20xf32>
    %149 = vector.extract_strided_slice %139 {offsets = [0, 128], sizes = [8, 20], strides = [1, 1]} : vector<8x384xf32> to vector<8x20xf32>
    %150 = arith.addf %148, %149 : vector<8x20xf32>
    %151 = arith.negf %150 : vector<8x20xf32>
    %152 = math.exp %151 : vector<8x20xf32>
    %cst_38 = arith.constant 1.000000e+00 : f32
    %153 = vector.broadcast %cst_38 : f32 to vector<8x20xf32>
    %154 = arith.addf %153, %152 : vector<8x20xf32>
    %155 = arith.divf %153, %154 : vector<8x20xf32>
    %156 = vector.extract_strided_slice %138 {offsets = [0, 256], sizes = [8, 20], strides = [1, 1]} : vector<8x384xf32> to vector<8x20xf32>
    %157 = vector.extract_strided_slice %139 {offsets = [0, 256], sizes = [8, 20], strides = [1, 1]} : vector<8x384xf32> to vector<8x20xf32>
    %158 = arith.addf %157, %12 : vector<8x20xf32>
    %159 = arith.mulf %147, %158 : vector<8x20xf32>
    %160 = arith.addf %156, %159 : vector<8x20xf32>
    %161 = math.tanh %160 : vector<8x20xf32>
    %162 = arith.subf %134, %161 : vector<8x20xf32>
    %163 = arith.mulf %155, %162 : vector<8x20xf32>
    %164 = arith.addf %161, %163 : vector<8x20xf32>
    %c5_i32 = arith.constant 5 : i32
    %c8_i32_39 = arith.constant 8 : i32
    %165 = arith.muli %c5_i32, %c8_i32_39 : i32
    %166 = tpu.assume_multiple %165, 8 : i32
    %167 = arith.index_cast %166 : i32 to index
    %c0_40 = arith.constant 0 : index
    %168 = vector.load %arg6[%167, %c0_40] : memref<64x384xf32, #tpu.memory_space<vmem>>, vector<8x384xf32>
    %cst_41 = arith.constant dense<0.000000e+00> : vector<8x384xf32>
    %169 = tpu.matmul %164, %8, %cst_41 {dimension_numbers = #tpu.dot_dimension_numbers<[1], [0], [0], [1], [0, 0, 1, 1], [], []>} : vector<8x20xf32>, vector<20x384xf32>, vector<8x384xf32> -> vector<8x384xf32>
    %170 = vector.extract_strided_slice %168 {offsets = [0, 0], sizes = [8, 20], strides = [1, 1]} : vector<8x384xf32> to vector<8x20xf32>
    %171 = vector.extract_strided_slice %169 {offsets = [0, 0], sizes = [8, 20], strides = [1, 1]} : vector<8x384xf32> to vector<8x20xf32>
    %172 = arith.addf %170, %171 : vector<8x20xf32>
    %173 = arith.negf %172 : vector<8x20xf32>
    %174 = math.exp %173 : vector<8x20xf32>
    %cst_42 = arith.constant 1.000000e+00 : f32
    %175 = vector.broadcast %cst_42 : f32 to vector<8x20xf32>
    %176 = arith.addf %175, %174 : vector<8x20xf32>
    %177 = arith.divf %175, %176 : vector<8x20xf32>
    %178 = vector.extract_strided_slice %168 {offsets = [0, 128], sizes = [8, 20], strides = [1, 1]} : vector<8x384xf32> to vector<8x20xf32>
    %179 = vector.extract_strided_slice %169 {offsets = [0, 128], sizes = [8, 20], strides = [1, 1]} : vector<8x384xf32> to vector<8x20xf32>
    %180 = arith.addf %178, %179 : vector<8x20xf32>
    %181 = arith.negf %180 : vector<8x20xf32>
    %182 = math.exp %181 : vector<8x20xf32>
    %cst_43 = arith.constant 1.000000e+00 : f32
    %183 = vector.broadcast %cst_43 : f32 to vector<8x20xf32>
    %184 = arith.addf %183, %182 : vector<8x20xf32>
    %185 = arith.divf %183, %184 : vector<8x20xf32>
    %186 = vector.extract_strided_slice %168 {offsets = [0, 256], sizes = [8, 20], strides = [1, 1]} : vector<8x384xf32> to vector<8x20xf32>
    %187 = vector.extract_strided_slice %169 {offsets = [0, 256], sizes = [8, 20], strides = [1, 1]} : vector<8x384xf32> to vector<8x20xf32>
    %188 = arith.addf %187, %12 : vector<8x20xf32>
    %189 = arith.mulf %177, %188 : vector<8x20xf32>
    %190 = arith.addf %186, %189 : vector<8x20xf32>
    %191 = math.tanh %190 : vector<8x20xf32>
    %192 = arith.subf %164, %191 : vector<8x20xf32>
    %193 = arith.mulf %185, %192 : vector<8x20xf32>
    %194 = arith.addf %191, %193 : vector<8x20xf32>
    %c6_i32 = arith.constant 6 : i32
    %c8_i32_44 = arith.constant 8 : i32
    %195 = arith.muli %c6_i32, %c8_i32_44 : i32
    %196 = tpu.assume_multiple %195, 8 : i32
    %197 = arith.index_cast %196 : i32 to index
    %c0_45 = arith.constant 0 : index
    %198 = vector.load %arg6[%197, %c0_45] : memref<64x384xf32, #tpu.memory_space<vmem>>, vector<8x384xf32>
    %cst_46 = arith.constant dense<0.000000e+00> : vector<8x384xf32>
    %199 = tpu.matmul %194, %8, %cst_46 {dimension_numbers = #tpu.dot_dimension_numbers<[1], [0], [0], [1], [0, 0, 1, 1], [], []>} : vector<8x20xf32>, vector<20x384xf32>, vector<8x384xf32> -> vector<8x384xf32>
    %200 = vector.extract_strided_slice %198 {offsets = [0, 0], sizes = [8, 20], strides = [1, 1]} : vector<8x384xf32> to vector<8x20xf32>
    %201 = vector.extract_strided_slice %199 {offsets = [0, 0], sizes = [8, 20], strides = [1, 1]} : vector<8x384xf32> to vector<8x20xf32>
    %202 = arith.addf %200, %201 : vector<8x20xf32>
    %203 = arith.negf %202 : vector<8x20xf32>
    %204 = math.exp %203 : vector<8x20xf32>
    %cst_47 = arith.constant 1.000000e+00 : f32
    %205 = vector.broadcast %cst_47 : f32 to vector<8x20xf32>
    %206 = arith.addf %205, %204 : vector<8x20xf32>
    %207 = arith.divf %205, %206 : vector<8x20xf32>
    %208 = vector.extract_strided_slice %198 {offsets = [0, 128], sizes = [8, 20], strides = [1, 1]} : vector<8x384xf32> to vector<8x20xf32>
    %209 = vector.extract_strided_slice %199 {offsets = [0, 128], sizes = [8, 20], strides = [1, 1]} : vector<8x384xf32> to vector<8x20xf32>
    %210 = arith.addf %208, %209 : vector<8x20xf32>
    %211 = arith.negf %210 : vector<8x20xf32>
    %212 = math.exp %211 : vector<8x20xf32>
    %cst_48 = arith.constant 1.000000e+00 : f32
    %213 = vector.broadcast %cst_48 : f32 to vector<8x20xf32>
    %214 = arith.addf %213, %212 : vector<8x20xf32>
    %215 = arith.divf %213, %214 : vector<8x20xf32>
    %216 = vector.extract_strided_slice %198 {offsets = [0, 256], sizes = [8, 20], strides = [1, 1]} : vector<8x384xf32> to vector<8x20xf32>
    %217 = vector.extract_strided_slice %199 {offsets = [0, 256], sizes = [8, 20], strides = [1, 1]} : vector<8x384xf32> to vector<8x20xf32>
    %218 = arith.addf %217, %12 : vector<8x20xf32>
    %219 = arith.mulf %207, %218 : vector<8x20xf32>
    %220 = arith.addf %216, %219 : vector<8x20xf32>
    %221 = math.tanh %220 : vector<8x20xf32>
    %222 = arith.subf %194, %221 : vector<8x20xf32>
    %223 = arith.mulf %215, %222 : vector<8x20xf32>
    %224 = arith.addf %221, %223 : vector<8x20xf32>
    %c7_i32 = arith.constant 7 : i32
    %c8_i32_49 = arith.constant 8 : i32
    %225 = arith.muli %c7_i32, %c8_i32_49 : i32
    %226 = tpu.assume_multiple %225, 8 : i32
    %227 = arith.index_cast %226 : i32 to index
    %c0_50 = arith.constant 0 : index
    %228 = vector.load %arg6[%227, %c0_50] : memref<64x384xf32, #tpu.memory_space<vmem>>, vector<8x384xf32>
    %cst_51 = arith.constant dense<0.000000e+00> : vector<8x384xf32>
    %229 = tpu.matmul %224, %8, %cst_51 {dimension_numbers = #tpu.dot_dimension_numbers<[1], [0], [0], [1], [0, 0, 1, 1], [], []>} : vector<8x20xf32>, vector<20x384xf32>, vector<8x384xf32> -> vector<8x384xf32>
    %230 = vector.extract_strided_slice %228 {offsets = [0, 0], sizes = [8, 20], strides = [1, 1]} : vector<8x384xf32> to vector<8x20xf32>
    %231 = vector.extract_strided_slice %229 {offsets = [0, 0], sizes = [8, 20], strides = [1, 1]} : vector<8x384xf32> to vector<8x20xf32>
    %232 = arith.addf %230, %231 : vector<8x20xf32>
    %233 = arith.negf %232 : vector<8x20xf32>
    %234 = math.exp %233 : vector<8x20xf32>
    %cst_52 = arith.constant 1.000000e+00 : f32
    %235 = vector.broadcast %cst_52 : f32 to vector<8x20xf32>
    %236 = arith.addf %235, %234 : vector<8x20xf32>
    %237 = arith.divf %235, %236 : vector<8x20xf32>
    %238 = vector.extract_strided_slice %228 {offsets = [0, 128], sizes = [8, 20], strides = [1, 1]} : vector<8x384xf32> to vector<8x20xf32>
    %239 = vector.extract_strided_slice %229 {offsets = [0, 128], sizes = [8, 20], strides = [1, 1]} : vector<8x384xf32> to vector<8x20xf32>
    %240 = arith.addf %238, %239 : vector<8x20xf32>
    %241 = arith.negf %240 : vector<8x20xf32>
    %242 = math.exp %241 : vector<8x20xf32>
    %cst_53 = arith.constant 1.000000e+00 : f32
    %243 = vector.broadcast %cst_53 : f32 to vector<8x20xf32>
    %244 = arith.addf %243, %242 : vector<8x20xf32>
    %245 = arith.divf %243, %244 : vector<8x20xf32>
    %246 = vector.extract_strided_slice %228 {offsets = [0, 256], sizes = [8, 20], strides = [1, 1]} : vector<8x384xf32> to vector<8x20xf32>
    %247 = vector.extract_strided_slice %229 {offsets = [0, 256], sizes = [8, 20], strides = [1, 1]} : vector<8x384xf32> to vector<8x20xf32>
    %248 = arith.addf %247, %12 : vector<8x20xf32>
    %249 = arith.mulf %237, %248 : vector<8x20xf32>
    %250 = arith.addf %246, %249 : vector<8x20xf32>
    %251 = math.tanh %250 : vector<8x20xf32>
    %252 = arith.subf %224, %251 : vector<8x20xf32>
    %253 = arith.mulf %245, %252 : vector<8x20xf32>
    %254 = arith.addf %251, %253 : vector<8x20xf32>
    %c8_i32_54 = arith.constant 8 : i32
    %255 = math.tanh %254 : vector<8x20xf32>
    %cst_55 = arith.constant dense<0.000000e+00> : vector<8x2xf32>
    %256 = tpu.matmul %255, %9, %cst_55 {dimension_numbers = #tpu.dot_dimension_numbers<[1], [0], [0], [1], [0, 0, 1, 1], [], []>, precision = #tpu.contract_precision<fp32>} : vector<8x20xf32>, vector<20x2xf32>, vector<8x2xf32> -> vector<8x2xf32>
    %257 = vector.broadcast %13 : vector<1x2xf32> to vector<8x2xf32>
    %258 = arith.addf %256, %257 : vector<8x2xf32>
    %cst_56 = arith.constant dense<0xFF800000> : vector<8xf32>
    %259 = vector.multi_reduction <maximumf>, %258, %cst_56 [1] : vector<8x2xf32> to vector<8xf32>
    %260 = vector.shape_cast %259 : vector<8xf32> to vector<8x1xf32>
    %261 = vector.broadcast %260 : vector<8x1xf32> to vector<8x2xf32>
    %262 = arith.subf %258, %261 : vector<8x2xf32>
    %263 = math.exp %262 : vector<8x2xf32>
    %cst_57 = arith.constant dense<0.000000e+00> : vector<8xf32>
    %264 = vector.multi_reduction <add>, %263, %cst_57 [1] : vector<8x2xf32> to vector<8xf32>
    %265 = vector.shape_cast %264 : vector<8xf32> to vector<8x1xf32>
    %266 = math.log %265 : vector<8x1xf32>
    %267 = vector.broadcast %266 : vector<8x1xf32> to vector<8x2xf32>
    %268 = arith.subf %262, %267 : vector<8x2xf32>
    %c0_58 = arith.constant 0 : index
    %c0_59 = arith.constant 0 : index
    %269 = vector.load %arg5[%c0_58, %c0_59] : memref<8x2xf32, #tpu.memory_space<vmem>>, vector<8x2xf32>
    tpu.vector_store %arg5[%c0_58, %c0_59], %268 {strides = array<i32>} : memref<8x2xf32, #tpu.memory_space<vmem>>, vector<8x2xf32>,
    return
  }
  func.func @transform_0(%arg0: i32) -> (i32, i32, i32) {
    %c0_i32 = arith.constant 0 : i32
    %c0_i32_0 = arith.constant 0 : i32
    %c0_i32_1 = arith.constant 0 : i32
    return %c0_i32, %arg0, %c0_i32_0 : i32, i32, i32
  }
  func.func @transform_1(%arg0: i32) -> (i32, i32) {
    %c0_i32 = arith.constant 0 : i32
    %c0_i32_0 = arith.constant 0 : i32
    %c0_i32_1 = arith.constant 0 : i32
    return %c0_i32, %c0_i32_0 : i32, i32
  }
  func.func @transform_2(%arg0: i32) -> (i32, i32) {
    %c0_i32 = arith.constant 0 : i32
    %c0_i32_0 = arith.constant 0 : i32
    %c0_i32_1 = arith.constant 0 : i32
    return %c0_i32, %c0_i32_0 : i32, i32
  }
  func.func @transform_3(%arg0: i32) -> (i32, i32) {
    %c0_i32 = arith.constant 0 : i32
    %c0_i32_0 = arith.constant 0 : i32
    %c0_i32_1 = arith.constant 0 : i32
    return %c0_i32, %c0_i32_0 : i32, i32
  }
  func.func @transform_4(%arg0: i32) -> (i32, i32) {
    %c0_i32 = arith.constant 0 : i32
    %c0_i32_0 = arith.constant 0 : i32
    return %arg0, %c0_i32 : i32, i32
  }
}

</mosaic_0001>

<bundles_post_ra>
// kernel: tpu_custom_call.1
= control target key start
LH: loop header
LB: loop body
LE: loop exit
PB: predicated region body
PF: predicated region fallthrough
CT: control target
= control target key end

     0   :  { %9 = vsyncpa [#allocation4], 0  ;;  %s3484_s0 = inlined_call_operand.hbm [shape: f32[8,8,10], index: 0, kind: input, shape index: {}]   ;;  %s3485_s1 = inlined_call_operand.hbm [shape: f32[10,384], index: 1, kind: input, shape index: {}]   ;;  %s3486_s2 = inlined_call_operand.hbm [shape: f32[20,512], index: 2, kind: input, shape index: {}]   ;;  %s3487_s3 = inlined_call_operand.hbm [shape: f32[1,640], index: 3, kind: input, shape index: {}]   ;;  %s3488_s4 = inlined_call_operand.vmem [shape: f32[8,2], index: 4, kind: output, shape index: {}]  }
   0x1   :  { %10 = vsyncpa [#allocation6], 0  ;;  %s29_s17 = sshll.u32 %s3485_s1, 4  ;;  %s30_s17 = int_to_ptr.hbm [resolvable:$true] %s29_s17 }
   0x2   :  { %11 = vsyncpa [#allocation9], 0  ;;  %s2725_s18 = smov [#allocation5]   ;;  %s16_s22 = sshll.u32 %s3484_s0, 4  ;;  %s17_s22 = int_to_ptr.hbm [resolvable:$true] %s16_s22 }
   0x3   :  { %s31_s19 = sshll.u32 %s2725_s18, 4  ;;  %s2726_s23 = smov 384   ;;  %s32_s19 = int_to_ptr.vmem [resolvable:$true] %s31_s19 }
   0x4   :  { %s2727_s24 = smov 24   ;;  %s2728_s25 = smov [#allocation3]  }
   0x5   :  { %37 = dma.hbm_to_vmem [thread:$0]  %s30_s17, 768, %s32_s19, [#allocation6], %s2726_s23, %s2726_s23, %s2727_s24  }
   0x6   :  { %s18_s26 = sshll.u32 %s2728_s25, 4  ;;  %s2729_s27 = smov 128   ;;  %s19_s26 = int_to_ptr.vmem [resolvable:$true] %s18_s26 }
   0x7   :  { %s2730_s28 = smov 8   ;;  %s42_s30 = sshll.u32 %s3486_s2, 4  ;;  %s43_s30 = int_to_ptr.hbm [resolvable:$true] %s42_s30 }
   0x8   :  { %24 = dma.hbm_to_vmem [thread:$0]  %s17_s22, 1024, %s19_s26, [#allocation4], %s2729_s27, %s2729_s27, %s2730_s28  }
   0x9   :  { %s2731_s5 = smov [#allocation7]   ;;  %s56_s8 = sshll.u32 %s3487_s3, 4  ;;  %s57_s8 = int_to_ptr.hbm [resolvable:$true] %s56_s8 }
   0xa   :  { %s44_s6 = sshll.u32 %s2731_s5, 4  ;;  %s2732_s9 = smov 512   ;;  %s45_s6 = int_to_ptr.vmem [resolvable:$true] %s44_s6 }
   0xb   :  { %s2733_s10 = smov 32   ;;  %s2734_s11 = smov [#allocation8]  }
   0xc   :  { %50 = dma.hbm_to_vmem [thread:$0]  %s43_s30, 1536, %s45_s6, [#allocation6], %s2732_s9, %s2732_s9, %s2733_s10  }
   0xd   :  { %s58_s12 = sshll.u32 %s2734_s11, 4  ;;  %s59_s12 = int_to_ptr.vmem [resolvable:$true] %s58_s12 }
   0xe   :  { %61 = dma.hbm_to_vmem [thread:$0]  %s57_s8, 80, %s59_s12, [#allocation9]  }
   0xf   :  { %2719 = dma.done.wait [#allocation4], 1024  }
  0x10   :  { %2720 = vsyncadd [#allocation4], 4294966272 }
  0x11   :  { %2721 = dma.done.wait [#allocation6], 2304  }
  0x12   :  { %2722 = vsyncadd [#allocation6], 4294964992 }
  0x13   :  { %2723 = dma.done.wait [#allocation9], 80  }
  0x14   :  { %2724 = vsyncadd [#allocation9], 4294967216  ;;  %vm125_vm0 = vcmask 1041408   ;;  %vm100_vm1 = vcmask 80896   ;;  %v89_v0 = vld [vmem:[#allocation5 + $0x18] sm:$0x3] }
  0x15   :  { %v86_v1 = vld [vmem:[#allocation5] sm:$0xff]  ;;  %v127_v3 = vsel %vm125_vm0, %v89_v0, 0  ;;  %v79_v7 = vld [vmem:[#allocation3 + $0x8] sm:$0xff]  ;;  %v80_v12 = vld [vmem:[#allocation3 + $0x10] sm:$0xff]  ;;  %vm1314_vm2 = vcmask 1043456   ;;  %vm1310_vm11 = vcmask 162816  }
  0x16   :  { %v78_v2 = vld [vmem:[#allocation3] sm:$0xff]  ;;  %v151_v4 = vand.u32 4294901760, %v86_v1  ;;  %v149_v8 = vand.u32 4294901760, %v127_v3  ;;  %v105_v11 = vsel %vm100_vm1, %v79_v7, 0  ;;  %v108_v21 = vsel %vm100_vm1, %v80_v12, 0  ;;  %v87_v31 = vld [vmem:[#allocation5 + $0x8] sm:$0xff] }
  0x17   :  { %v102_v5 = vsel %vm100_vm1, %v78_v2, 0  ;;  %v90_v6 = vld [vmem:[#allocation5 + $0x20] sm:$0x3]  ;;  %v2781_v15 = vand.u32 4294901760, %v105_v11  ;;  %v2800_v29 = vand.u32 4294901760, %v108_v21  ;;  %v81_v35 = vld [vmem:[#allocation3 + $0x18] sm:$0xff] }
  0x18   :  { %v2775_v9 = vand.u32 4294901760, %v102_v5  ;;  %v130_v10 = vsel %vm125_vm0, %v90_v6, 0  ;;  %v239_v13 = vsub.f32 %v86_v1, %v151_v4  ;;  %353 = vmatpush.msra.mxu3 %v149_v8  ;;  %v233_v16 = vsub.f32 %v127_v3, %v149_v8  ;;  %150 = vmatpush.msra.mxu0 %v149_v8  ;;  %v82_v44 = vld [vmem:[#allocation3 + $0x20] sm:$0xff]  ;;  %v83_v54 = vld [vmem:[#allocation3 + $0x28] sm:$0xff]  ;;  %v84_v62 = vld [vmem:[#allocation3 + $0x30] sm:$0xff] }
  0x19   :  { %v2779_v14 = vand.u32 4294901760, %v130_v10  ;;  %v2787_v19 = vsub.f32 %v105_v11, %v2781_v15  ;;  %v527_v37 = vand.u32 4294901760, %v87_v31  ;;  %v2810_v39 = vsub.f32 %v108_v21, %v2800_v29 }
  0x1a   :  { %v2784_v17 = vsub.f32 %v102_v5, %v2775_v9  ;;  %v240_v18 = vand.u32 4294901760, %v239_v13  ;;  %293 = vmatpush.msra.mxu2 %v233_v16  ;;  %355 = vmatpush.msra.mxu3 %v151_v4  ;;  %v234_v23 = vand.u32 4294901760, %v233_v16  ;;  %v111_v40 = vsel %vm100_vm1, %v81_v35, 0  ;;  %v85_v5 = vld [vmem:[#allocation3 + $0x38] sm:$0xff] }
  0x1b   :  { %v609_v20 = vsub.f32 %v130_v10, %v2779_v14  ;;  %152 = vmatpush.msra.mxu0 %v151_v4  ;;  %v2798_v28 = vand.u32 4294901760, %v2787_v19  ;;  %v2818_v42 = vand.u32 4294901760, %v2810_v39  ;;  %v2820_v43 = vand.u32 4294901760, %v111_v40 }
  0x1c   :  { %v2792_v22 = vand.u32 4294901760, %v2784_v17  ;;  %v241_v24 = vsub.f32 %v239_v13, %v240_v18  ;;  %296 = vmatpush.msra.mxu2 %v239_v13  ;;  %v235_v27 = vsub.f32 %v233_v16, %v234_v23  ;;  %v615_v47 = vsub.f32 %v87_v31, %v527_v37 }
  0x1d   :  { %v610_v25 = vand.u32 4294901760, %v609_v20  ;;  %299 = vmatmul.f32.vlgmr.msra.gmra.mxu2 %v2784_v17  ;;  %422 = vmatpush.msrb.mxu0 %v234_v23  ;;  %v164_v38 = vsub.f32 %v2787_v19, %v2798_v28  ;;  %v172_v45 = vsub.f32 %v2810_v39, %v2818_v42  ;;  %v2828_v46 = vsub.f32 %v111_v40, %v2820_v43  ;;  %v91_v23 = vld [vmem:[#allocation5 + $0x28] sm:$0x3] }
  0x1e   :  { %359 = vmatmul.f32.vlgmr.msra.gmra.mxu3 %v2792_v22  ;;  %v156_v26 = vsub.f32 %v2784_v17, %v2792_v22  ;;  %526 = vmatpush.msrb.mxu2 %v2779_v14  ;;  %v236_v33 = vand.u32 4294901760, %v235_v27  ;;  %v242_v34 = vand.u32 4294901760, %v241_v24  ;;  %v114_v48 = vsel %vm100_vm1, %v82_v44, 0  ;;  %v2953_v27 = vld [vmem:[#allocation8] sm:$0x7] }
  0x1f   :  { %v611_v30 = vsub.f32 %v609_v20, %v610_v25  ;;  %426 = vmatpush.msrb.mxu0 %v240_v18  ;;  %v2815_v41 = vand.u32 4294901760, %v164_v38  ;;  %v616_v49 = vand.u32 4294901760, %v615_v47  ;;  %v2833_v50 = vand.u32 4294901760, %v172_v45 }
  0x20   :  { %v2804_v32 = vand.u32 4294901760, %v156_v26  ;;  %237 = vmatpush.msra.mxu1 %v236_v33  ;;  %528 = vmatpush.msrb.mxu2 %v527_v37  ;;  %v2836_v51 = vand.u32 4294901760, %v2828_v46  ;;  %v2838_v52 = vand.u32 4294901760, %v114_v48  ;;  %v117_v58 = vsel %vm100_vm1, %v83_v54, 0 }
  0x21   :  { %v612_v36 = vand.u32 4294901760, %v611_v30  ;;  %v617_v53 = vsub.f32 %v615_v47, %v616_v49  ;;  %v2856_v61 = vand.u32 4294901760, %v117_v58  ;;  %v120_v1 = vsel %vm100_vm1, %v84_v62, 0 }
  0x22   :  { %158 = vmatmul.f32.vlgmr.msra.gmra.mxu0 %v2804_v32  ;;  %243 = vmatpush.msra.mxu1 %v242_v34  ;;  %v180_v56 = vsub.f32 %v2828_v46, %v2836_v51  ;;  %v2845_v57 = vsub.f32 %v114_v48, %v2838_v52  ;;  %v133_v24 = vsel %vm125_vm0, %v91_v23, 0  ;;  %v2957_v30 = vperm.slane %v2953_v27, 0  ;;  %v88_v34 = vld [vmem:[#allocation5 + $0x10] sm:$0xff] }
  0x23   :  { %613 = vmatpush.msrb.mxu3 %v612_v36  ;;  %798 = vmatpush.msra.mxu2 %v610_v25  ;;  %v618_v55 = vand.u32 4294901760, %v617_v53  ;;  %v2863_v0 = vsub.f32 %v117_v58, %v2856_v61  ;;  %v2937_v25 = vand.u32 4294901760, %v133_v24  ;;  %v2963_v36 = vand.u32 4294901760, %v88_v34 }
  0x24   :  { %245 = vmatmul.f32.vlgmr.msra.gmra.mxu1 %v2775_v9  ;;  %669 = vmatpush.msra.mxu0 %v609_v20  ;;  %v2851_v59 = vand.u32 4294901760, %v180_v56  ;;  %v2854_v60 = vand.u32 4294901760, %v2845_v57 }
  0x25   :  { %475 = vmatpush.msrb.mxu1 %v149_v8  ;;  %304 = vmatmul.f32.gmra.mxu2 %v2787_v19  ;;  %v2871_v3 = vand.u32 4294901760, %v2863_v0  ;;  %v123_v8 = vsel %vm100_vm1, %v85_v5, 0  ;;  %v985_v26 = vsub.f32 %v133_v24, %v2937_v25  ;;  %v991_v44 = vsub.f32 %v88_v34, %v2963_v36 }
  0x26   :  { %365 = vmatmul.f32.gmra.mxu3 %v2798_v28  ;;  %672 = vmatpush.msra.mxu0 %v615_v47  ;;  %v188_v63 = vsub.f32 %v2845_v57, %v2854_v60  ;;  %v2890_v12 = vand.u32 4294901760, %v123_v8 }
  0x27   :  { %477 = vmatpush.msrb.mxu1 %v151_v4  ;;  %802 = vmatpush.msra.mxu2 %v616_v49  ;;  %v2873_v4 = vand.u32 4294901760, %v120_v1  ;;  %v196_v6 = vsub.f32 %v2863_v0, %v2871_v3  ;;  %v986_v47 = vand.u32 4294901760, %v985_v26 }
  0x28   :  { %619 = vmatpush.msrb.mxu3 %v618_v55  ;;  %v2868_v2 = vand.u32 4294901760, %v188_v63 }
  0x29   :  { %729 = vmatpush.msra.mxu1 %v2779_v14  ;;  %v2880_v7 = vsub.f32 %v120_v1, %v2873_v4  ;;  %v2885_v10 = vand.u32 4294901760, %v196_v6  ;;  %v987_v49 = vsub.f32 %v985_v26, %v986_v47 }
  0x2a   :  { %166 = vmatmul.f32.gmra.mxu0 %v2815_v41  ;;  %851 = vmatpush.msra.mxu3 %v2779_v14  ;;  %v2897_v14 = vsub.f32 %v123_v8, %v2890_v12 }
  0x2b   :  { %731 = vmatpush.msra.mxu1 %v527_v37  ;;  %v2888_v11 = vand.u32 4294901760, %v2880_v7  ;;  %v988_v56 = vand.u32 4294901760, %v987_v49 }
  0x2c   :  { %249 = vmatmul.f32.gmra.mxu1 %v2781_v15  ;;  %853 = vmatpush.msra.mxu3 %v527_v37  ;;  %v2904_v18 = vand.u32 4294901760, %v2897_v14 }
  0x2d   :  { %309 = vmatmul.f32.gmra.mxu2 %v2810_v39  ;;  %v204_v13 = vsub.f32 %v2880_v7, %v2888_v11 }
  0x2e   :  { %371 = vmatmul.f32.gmra.mxu3 %v2818_v42  ;;  %v212_v20 = vsub.f32 %v2897_v14, %v2904_v18 }
  0x2f   :  { %v2901_v16 = vand.u32 4294901760, %v204_v13 }
  0x30   :  { %v2912_v21 = vand.u32 4294901760, %v212_v20 }
  0x32   :  { %174 = vmatmul.f32.gmra.mxu0 %v2833_v50 }
  0x34   :  { %253 = vmatmul.f32.gmra.mxu1 %v2800_v29 }
  0x35   :  { %314 = vmatmul.f32.gmra.mxu2 %v2828_v46 }
  0x36   :  { %377 = vmatmul.f32.gmra.mxu3 %v2836_v51 }
  0x3a   :  { %182 = vmatmul.f32.gmra.mxu0 %v2851_v59 }
  0x3c   :  { %257 = vmatmul.f32.gmra.mxu1 %v2820_v43 }
  0x3d   :  { %319 = vmatmul.f32.gmra.mxu2 %v2845_v57 }
  0x3e   :  { %383 = vmatmul.f32.gmra.mxu3 %v2854_v60 }
  0x42   :  { %190 = vmatmul.f32.gmra.mxu0 %v2868_v2 }
  0x44   :  { %261 = vmatmul.f32.gmra.mxu1 %v2838_v52 }
  0x45   :  { %324 = vmatmul.f32.gmra.mxu2 %v2863_v0 }
  0x46   :  { %389 = vmatmul.f32.gmra.mxu3 %v2871_v3 }
  0x4a   :  { %198 = vmatmul.f32.gmra.mxu0 %v2885_v10 }
  0x4c   :  { %265 = vmatmul.f32.gmra.mxu1 %v2856_v61 }
  0x4d   :  { %329 = vmatmul.f32.gmra.mxu2 %v2880_v7 }
  0x4e   :  { %395 = vmatmul.f32.gmra.mxu3 %v2888_v11 }
  0x52   :  { %206 = vmatmul.f32.gmra.mxu0 %v2901_v16 }
  0x54   :  { %269 = vmatmul.f32.gmra.mxu1 %v2873_v4 }
  0x55   :  { %334 = vmatmul.f32.gmra.mxu2 %v2897_v14 }
  0x56   :  { %401 = vmatmul.f32.gmra.mxu3 %v2904_v18 }
  0x5a   :  { %214 = vmatmul.f32.gmra.mxu0 %v2912_v21 }
  0x5c   :  { %273 = vmatmul.f32.gmra.mxu1 %v2890_v12 }
  0x5d   :  { %534 = vmatmul.f32.vlgmr.msrb.gmra.mxu2 %v2804_v32 }
  0x5e   :  { %621 = vmatmul.f32.vlgmr.msrb.gmra.mxu3 %v2775_v9  ;;  %1045 = vmatpush.msrb.mxu2 %v985_v26 }
  0x5f   :  { %1105 = vmatpush.msrb.mxu3 %v2937_v25 }
  0x60   :  { %1048 = vmatpush.msrb.mxu2 %v991_v44 }
  0x61   :  { %1107 = vmatpush.msrb.mxu3 %v2963_v36 }
  0x62   :  { %428 = vmatmul.f32.vlgmr.msrb.gmra.mxu0 %v2775_v9 }
  0x63   :  { %902 = vmatpush.msrb.mxu0 %v2937_v25 }
  0x64   :  { %479 = vmatmul.f32.vlgmr.msrb.gmra.mxu1 %v2775_v9 }
  0x65   :  { %542 = vmatmul.f32.gmra.mxu2 %v2815_v41  ;;  %904 = vmatpush.msrb.mxu0 %v2963_v36 }
  0x66   :  { %625 = vmatmul.f32.gmra.mxu3 %v2781_v15  ;;  %989 = vmatpush.msrb.mxu1 %v988_v56 }
  0x6a   :  { %432 = vmatmul.f32.gmra.mxu0 %v2781_v15 }
  0x6c   :  { %483 = vmatmul.f32.gmra.mxu1 %v2781_v15 }
  0x6d   :  { %550 = vmatmul.f32.gmra.mxu2 %v2833_v50 }
  0x6e   :  { %629 = vmatmul.f32.gmra.mxu3 %v2800_v29 }
  0x72   :  { %436 = vmatmul.f32.gmra.mxu0 %v2800_v29 }
  0x74   :  { %487 = vmatmul.f32.gmra.mxu1 %v2800_v29 }
  0x75   :  { %558 = vmatmul.f32.gmra.mxu2 %v2851_v59 }
  0x76   :  { %633 = vmatmul.f32.gmra.mxu3 %v2820_v43 }
  0x7a   :  { %440 = vmatmul.f32.gmra.mxu0 %v2820_v43 }
  0x7c   :  { %491 = vmatmul.f32.gmra.mxu1 %v2820_v43 }
  0x7d   :  { %566 = vmatmul.f32.gmra.mxu2 %v2868_v2 }
  0x7e   :  { %637 = vmatmul.f32.gmra.mxu3 %v2838_v52 }
  0x82   :  { %444 = vmatmul.f32.gmra.mxu0 %v2838_v52 }
  0x84   :  { %495 = vmatmul.f32.gmra.mxu1 %v2838_v52 }
  0x85   :  { %574 = vmatmul.f32.gmra.mxu2 %v2885_v10 }
  0x86   :  { %641 = vmatmul.f32.gmra.mxu3 %v2856_v61 }
  0x8a   :  { %448 = vmatmul.f32.gmra.mxu0 %v2856_v61 }
  0x8c   :  { %499 = vmatmul.f32.gmra.mxu1 %v2856_v61 }
  0x8d   :  { %582 = vmatmul.f32.gmra.mxu2 %v2901_v16 }
  0x8e   :  { %645 = vmatmul.f32.gmra.mxu3 %v2873_v4 }
  0x92   :  { %452 = vmatmul.f32.gmra.mxu0 %v2873_v4 }
  0x94   :  { %503 = vmatmul.f32.gmra.mxu1 %v2873_v4 }
  0x95   :  { %590 = vmatmul.f32.gmra.mxu2 %v2912_v21 }
  0x96   :  { %649 = vmatmul.f32.gmra.mxu3 %v2890_v12 }
  0x9a   :  { %456 = vmatmul.f32.gmra.mxu0 %v2890_v12 }
  0x9c   :  { %507 = vmatmul.f32.gmra.mxu1 %v2890_v12 }
  0x9d   :  { %804 = vmatmul.f32.vlgmr.msra.gmra.mxu2 %v2775_v9 }
  0x9e   :  { %855 = vmatmul.f32.vlgmr.msra.gmra.mxu3 %v2775_v9 }
  0x9f   :  { %v159_v31 = vpop.f32.mrf.mxu0 }
  0xa0   :  { %v160_v33 = vadd.f32 %v159_v31, %v2957_v30  ;;  %v300_v38 = vpop.f32.mrf.mxu2 }
  0xa1   :  { %v360_v35 = vpop.f32.mrf.mxu3  ;;  %v246_v37 = vpop.f32.mrf.mxu1 }
  0xa2   :  { %675 = vmatmul.f32.vlgmr.msra.gmra.mxu0 %v2784_v17  ;;  %v247_v40 = vadd.f32 %v246_v37, %v160_v33 }
  0xa3   :  { %1174 = vmatpush.msra.mxu0 %v986_v47  ;;  %v992_v47 = vand.u32 4294901760, %v991_v44 }
  0xa4   :  { %v301_v45 = vadd.f32 %v300_v38, %v247_v40  ;;  %735 = vmatmul.f32.vlgmr.msra.gmra.mxu1 %v2792_v22 }
  0xa5   :  { %808 = vmatmul.f32.gmra.mxu2 %v2781_v15  ;;  %v993_v56 = vsub.f32 %v991_v44, %v992_v47  ;;  %1178 = vmatpush.msra.mxu0 %v992_v47 }
  0xa6   :  { %859 = vmatmul.f32.gmra.mxu3 %v2781_v15  ;;  %v2972_v53 = vadd.f32 %v360_v35, %v301_v45 }
  0xa7   :  { %v167_v48 = vpop.f32.mrf.mxu0 }
  0xa8   :  { %v168_v54 = vadd.f32 %v167_v48, %v2957_v30  ;;  %v305_v62 = vpop.f32.mrf.mxu2 }
  0xa9   :  { %v366_v55 = vpop.f32.mrf.mxu3  ;;  %v250_v58 = vpop.f32.mrf.mxu1 }
  0xaa   :  { %680 = vmatmul.f32.gmra.mxu0 %v2787_v19  ;;  %v251_v63 = vadd.f32 %v250_v58, %v168_v54 }
  0xac   :  { %v306_v1 = vadd.f32 %v305_v62, %v251_v63  ;;  %741 = vmatmul.f32.gmra.mxu1 %v2798_v28 }
  0xad   :  { %812 = vmatmul.f32.gmra.mxu2 %v2800_v29 }
  0xae   :  { %863 = vmatmul.f32.gmra.mxu3 %v2800_v29  ;;  %v2979_v6 = vadd.f32 %v366_v55, %v306_v1  ;;  %v2996_v55 = vld [vmem:[#allocation7 + $0x40] sm:$0xf]  ;;  %v994_v1 = vand.u32 4294901760, %v993_v56 }
  0xaf   :  { %v175_v5 = vpop.f32.mrf.mxu0  ;;  %2453 = vmatpush.msk.msra.mxu2 %vm1314_vm2, %v2996_v55 }
  0xb0   :  { %v176_v8 = vadd.f32 %v175_v5, %v2957_v30  ;;  %v310_v23 = vpop.f32.mrf.mxu2  ;;  %995 = vmatpush.msrb.mxu1 %v994_v1 }
  0xb1   :  { %v372_v13 = vpop.f32.mrf.mxu3  ;;  %v254_v20 = vpop.f32.mrf.mxu1 }
  0xb2   :  { %685 = vmatmul.f32.gmra.mxu0 %v2810_v39  ;;  %v255_v24 = vadd.f32 %v254_v20, %v176_v8  ;;  %1227 = vmatpush.msra.mxu1 %v2937_v25 }
  0xb4   :  { %v311_v26 = vadd.f32 %v310_v23, %v255_v24  ;;  %747 = vmatmul.f32.gmra.mxu1 %v2818_v42 }
  0xb5   :  { %816 = vmatmul.f32.gmra.mxu2 %v2820_v43  ;;  %1229 = vmatpush.msra.mxu1 %v2963_v36 }
  0xb6   :  { %867 = vmatmul.f32.gmra.mxu3 %v2820_v43  ;;  %v2986_v33 = vadd.f32 %v372_v13, %v311_v26 }
  0xb7   :  { %v183_v31 = vpop.f32.mrf.mxu0 }
  0xb8   :  { %v184_v34 = vadd.f32 %v183_v31, %v2957_v30  ;;  %v315_v38 = vpop.f32.mrf.mxu2 }
  0xb9   :  { %v378_v35 = vpop.f32.mrf.mxu3  ;;  %v258_v37 = vpop.f32.mrf.mxu1 }
  0xba   :  { %690 = vmatmul.f32.gmra.mxu0 %v2828_v46  ;;  %v259_v40 = vadd.f32 %v258_v37, %v184_v34  ;;  %v3010_v34 = vld [vmem:[#allocation7 + $0x48] sm:$0xf] }
  0xbb   :  { %2454 = vmatpush.msk.msra.mxu3 %vm1314_vm2, %v3010_v34 }
  0xbc   :  { %v316_v45 = vadd.f32 %v315_v38, %v259_v40  ;;  %753 = vmatmul.f32.gmra.mxu1 %v2836_v51 }
  0xbd   :  { %820 = vmatmul.f32.gmra.mxu2 %v2838_v52 }
  0xbe   :  { %871 = vmatmul.f32.gmra.mxu3 %v2838_v52  ;;  %v2993_v49 = vadd.f32 %v378_v35, %v316_v45 }
  0xbf   :  { %v191_v48 = vpop.f32.mrf.mxu0 }
  0xc0   :  { %3489 = vst [vmem:[#allocation13_spill] sm:$0xff] %v2993_v49  ;;  %v192_v54 = vadd.f32 %v191_v48, %v2957_v30  ;;  %v320_v63 = vpop.f32.mrf.mxu2 }
  0xc1   :  { %v384_v58 = vpop.f32.mrf.mxu3  ;;  %v262_v62 = vpop.f32.mrf.mxu1 }
  0xc2   :  { %695 = vmatmul.f32.gmra.mxu0 %v2845_v57  ;;  %v263_v5 = vadd.f32 %v262_v62, %v192_v54  ;;  %v3022_v54 = vld [vmem:[#allocation7 + $0x20] sm:$0xff] }
  0xc3   :  { %1338 = vmatpush.msra.mxu2 %v3022_v54 }
  0xc4   :  { %v321_v8 = vadd.f32 %v320_v63, %v263_v5  ;;  %759 = vmatmul.f32.gmra.mxu1 %v2854_v60 }
  0xc5   :  { %824 = vmatmul.f32.gmra.mxu2 %v2856_v61 }
  0xc6   :  { %875 = vmatmul.f32.gmra.mxu3 %v2856_v61  ;;  %v3005_v13 = vadd.f32 %v384_v58, %v321_v8 }
  0xc7   :  { %v199_v44 = vpop.f32.mrf.mxu0 }
  0xc8   :  { %3490 = vst [vmem:[#allocation14_spill] sm:$0xff] %v3005_v13  ;;  %v200_v20 = vadd.f32 %v199_v44, %v2957_v30  ;;  %v325_v26 = vpop.f32.mrf.mxu2 }
  0xc9   :  { %v390_v23 = vpop.f32.mrf.mxu3  ;;  %v266_v24 = vpop.f32.mrf.mxu1 }
  0xca   :  { %700 = vmatmul.f32.gmra.mxu0 %v2863_v0  ;;  %v267_v31 = vadd.f32 %v266_v24, %v200_v20 }
  0xcc   :  { %v326_v25 = vadd.f32 %v325_v26, %v267_v31  ;;  %765 = vmatmul.f32.gmra.mxu1 %v2871_v3 }
  0xcd   :  { %828 = vmatmul.f32.gmra.mxu2 %v2873_v4 }
  0xce   :  { %879 = vmatmul.f32.gmra.mxu3 %v2873_v4  ;;  %v3017_v36 = vadd.f32 %v390_v23, %v326_v25  ;;  %v3037_v23 = vperm.slane %v2953_v27, 1 }
  0xcf   :  { %v207_v35 = vpop.f32.mrf.mxu0 }
  0xd0   :  { %3491 = vst [vmem:[#allocation15_spill] sm:$0xff] %v3017_v36  ;;  %v208_v37 = vadd.f32 %v207_v35, %v2957_v30  ;;  %v330_v45 = vpop.f32.mrf.mxu2  ;;  %v3045_v35 = vld [vmem:[#allocation7 + $0x28] sm:$0xff] }
  0xd1   :  { %v396_v38 = vpop.f32.mrf.mxu3  ;;  %v270_v40 = vpop.f32.mrf.mxu1  ;;  %1358 = vmatpush.msra.mxu3 %v3045_v35 }
  0xd2   :  { %705 = vmatmul.f32.gmra.mxu0 %v2880_v7  ;;  %v271_v47 = vadd.f32 %v270_v40, %v208_v37 }
  0xd4   :  { %v331_v48 = vadd.f32 %v330_v45, %v271_v47  ;;  %771 = vmatmul.f32.gmra.mxu1 %v2888_v11  ;;  %v3066_v45 = vld [vmem:[#allocation7] sm:$0xff] }
  0xd5   :  { %832 = vmatmul.f32.gmra.mxu2 %v2890_v12 }
  0xd6   :  { %883 = vmatmul.f32.gmra.mxu3 %v2890_v12  ;;  %v3027_v58 = vadd.f32 %v396_v38, %v331_v48  ;;  %1339 = vmatpush.msra.mxu2 %v3066_v45 }
  0xd7   :  { %v215_v56 = vpop.f32.mrf.mxu0 }
  0xd8   :  { %3492 = vst [vmem:[#allocation16_spill] sm:$0xff] %v3027_v58  ;;  %v216_v62 = vadd.f32 %v215_v56, %v2957_v30  ;;  %v335_v5 = vpop.f32.mrf.mxu2 }
  0xd9   :  { %v402_v63 = vpop.f32.mrf.mxu3  ;;  %v274_v1 = vpop.f32.mrf.mxu1 }
  0xda   :  { %710 = vmatmul.f32.gmra.mxu0 %v2897_v14  ;;  %v275_v8 = vadd.f32 %v274_v1, %v216_v62 }
  0xdc   :  { %v336_v44 = vadd.f32 %v335_v5, %v275_v8  ;;  %777 = vmatmul.f32.gmra.mxu1 %v2904_v18  ;;  %v3138_v8 = vld [vmem:[#allocation7 + $0x50] sm:$0xf] }
  0xdd   :  { %1051 = vmatmul.f32.vlgmr.msrb.gmra.mxu2 %v2784_v17 }
  0xde   :  { %1111 = vmatmul.f32.vlgmr.msrb.gmra.mxu3 %v2792_v22  ;;  %v3039_v24 = vadd.f32 %v402_v63, %v336_v44  ;;  %2455 = vmatpush.msk.msrb.mxu2 %vm1314_vm2, %v3138_v8 }
  0xdf   :  { %v3033_v20 = vpop.f32.mrf.mxu0 }
  0xe0   :  { %3493 = vst [vmem:[#allocation17_spill] sm:$0xff] %v3039_v24  ;;  %v535_v31 = vpop.f32.mrf.mxu2 }
  0xe1   :  { %v622_v30 = vpop.f32.mrf.mxu3  ;;  %v3041_v26 = vpop.f32.mrf.mxu1  ;;  %v536_v25 = vadd.f32 %v535_v31, %v3037_v23 }
  0xe2   :  { %910 = vmatmul.f32.vlgmr.msrb.gmra.mxu0 %v2804_v32 }
  0xe3   :  { %2492 = vmatpush.msk.msrb.mxu0 %vm1314_vm2, %v3010_v34  ;;  %v3051_v17 = vadd.f32 %v622_v30, %v536_v25 }
  0xe4   :  { %997 = vmatmul.f32.vlgmr.msrb.gmra.mxu1 %v2775_v9 }
  0xe5   :  { %1938 = vmatpush.msrb.mxu0 %v3045_v35  ;;  %1056 = vmatmul.f32.gmra.mxu2 %v2787_v19 }
  0xe6   :  { %1117 = vmatmul.f32.gmra.mxu3 %v2798_v28  ;;  %2494 = vmatpush.msk.msrb.mxu1 %vm1314_vm2, %v3138_v8 }
  0xe7   :  { %v3055_v22 = vpop.f32.mrf.mxu0 }
  0xe8   :  { %v543_v38 = vpop.f32.mrf.mxu2 }
  0xe9   :  { %v3058_v32 = vpop.f32.mrf.mxu3  ;;  %v3060_v37 = vpop.f32.mrf.mxu1  ;;  %v3064_v40 = vadd.f32 %v543_v38, %v3037_v23 }
  0xea   :  { %918 = vmatmul.f32.gmra.mxu0 %v2815_v41 }
  0xec   :  { %1001 = vmatmul.f32.gmra.mxu1 %v2781_v15 }
  0xed   :  { %1061 = vmatmul.f32.gmra.mxu2 %v2810_v39 }
  0xee   :  { %1123 = vmatmul.f32.gmra.mxu3 %v2818_v42  ;;  %v3086_v42 = vld [vmem:[#allocation7 + $0x8] sm:$0xff] }
  0xef   :  { %v3071_v28 = vpop.f32.mrf.mxu0  ;;  %1359 = vmatpush.msra.mxu3 %v3086_v42  ;;  %1939 = vmatpush.msrb.mxu0 %v3086_v42 }
  0xf0   :  { %v3078_v41 = vpop.f32.mrf.mxu2 }
  0xf1   :  { %v3074_v19 = vpop.f32.mrf.mxu3  ;;  %v3076_v47 = vpop.f32.mrf.mxu1  ;;  %2458 = vmatpush.msk.msrb.mxu3 %vm1314_vm2, %v2996_v55 }
  0xf2   :  { %3494 = vst [vmem:[#allocation18_spill] sm:$0xff] %v3076_v47  ;;  %926 = vmatmul.f32.gmra.mxu0 %v2833_v50 }
  0xf3   :  { %1454 = vmatpush.msrb.mxu3 %v3022_v54 }
  0xf4   :  { %1005 = vmatmul.f32.gmra.mxu1 %v2800_v29 }
  0xf5   :  { %1066 = vmatmul.f32.gmra.mxu2 %v2828_v46  ;;  %1455 = vmatpush.msrb.mxu3 %v3066_v45 }
  0xf6   :  { %1129 = vmatmul.f32.gmra.mxu3 %v2836_v51 }
  0xf7   :  { %v3083_v48 = vpop.f32.mrf.mxu0 }
  0xf8   :  { %3495 = vst [vmem:[#allocation19_spill] sm:$0xff] %v3083_v48  ;;  %v3094_v62 = vpop.f32.mrf.mxu2 }
  0xf9   :  { %v3088_v56 = vpop.f32.mrf.mxu3  ;;  %v3092_v39 = vpop.f32.mrf.mxu1 }
  0xfa   :  { %3496 = vst [vmem:[#allocation20_spill] sm:$0xff] %v3092_v39  ;;  %934 = vmatmul.f32.gmra.mxu0 %v2851_v59 }
  0xfc   :  { %1009 = vmatmul.f32.gmra.mxu1 %v2820_v43 }
  0xfd   :  { %1071 = vmatmul.f32.gmra.mxu2 %v2845_v57 }
  0xfe   :  { %1135 = vmatmul.f32.gmra.mxu3 %v2854_v60 }
  0xff   :  { %v3102_v46 = vpop.f32.mrf.mxu0 }
 0x100   :  { %3497 = vst [vmem:[#allocation21_spill] sm:$0xff] %v3102_v46  ;;  %v3110_v59 = vpop.f32.mrf.mxu2 }
 0x101   :  { %v3106_v50 = vpop.f32.mrf.mxu3  ;;  %v3108_v51 = vpop.f32.mrf.mxu1 }
 0x102   :  { %3498 = vst [vmem:[#allocation22_spill] sm:$0xff] %v3108_v51  ;;  %942 = vmatmul.f32.gmra.mxu0 %v2868_v2  ;;  %v568_v51 = vadd.f32 %v3110_v59, %v3037_v23 }
 0x104   :  { %1013 = vmatmul.f32.gmra.mxu1 %v2838_v52  ;;  %v639_v48 = vadd.f32 %v3106_v50, %v568_v51 }
 0x105   :  { %1076 = vmatmul.f32.gmra.mxu2 %v2863_v0 }
 0x106   :  { %1141 = vmatmul.f32.gmra.mxu3 %v2871_v3 }
 0x107   :  { %v3115_v63 = vpop.f32.mrf.mxu0 }
 0x108   :  { %3499 = vst [vmem:[#allocation23_spill] sm:$0xff] %v3115_v63  ;;  %v3122_v1 = vpop.f32.mrf.mxu2 }
 0x109   :  { %v3118_v60 = vpop.f32.mrf.mxu3  ;;  %v3120_v57 = vpop.f32.mrf.mxu1 }
 0x10a   :  { %3500 = vst [vmem:[#allocation24_spill] sm:$0xff] %v3120_v57  ;;  %950 = vmatmul.f32.gmra.mxu0 %v2885_v10  ;;  %v3140_v10 = vld [vmem:[#allocation7 + $0x30] sm:$0xff] }
 0x10b   :  { %1378 = vmatpush.msrb.mxu2 %v3140_v10  ;;  %1958 = vmatpush.msrb.mxu1 %v3140_v10 }
 0x10c   :  { %1017 = vmatmul.f32.gmra.mxu1 %v2856_v61 }
 0x10d   :  { %1081 = vmatmul.f32.gmra.mxu2 %v2880_v7 }
 0x10e   :  { %1147 = vmatmul.f32.gmra.mxu3 %v2888_v11 }
 0x10f   :  { %v3127_v2 = vpop.f32.mrf.mxu0 }
 0x110   :  { %3501 = vst [vmem:[#allocation25_spill] sm:$0xff] %v3127_v2  ;;  %v3134_v0 = vpop.f32.mrf.mxu2 }
 0x111   :  { %v3130_v3 = vpop.f32.mrf.mxu3  ;;  %v3132_v5 = vpop.f32.mrf.mxu1 }
 0x112   :  { %3502 = vst [vmem:[#allocation26_spill] sm:$0xff] %v3132_v5  ;;  %958 = vmatmul.f32.gmra.mxu0 %v2901_v16  ;;  %v3153_v16 = vld [vmem:[#allocation7 + $0x10] sm:$0xff]  ;;  %v560_v5 = vadd.f32 %v3094_v62, %v3037_v23 }
 0x113   :  { %1379 = vmatpush.msrb.mxu2 %v3153_v16  ;;  %1959 = vmatpush.msrb.mxu1 %v3153_v16 }
 0x114   :  { %1021 = vmatmul.f32.gmra.mxu1 %v2873_v4  ;;  %v635_v57 = vadd.f32 %v3088_v56, %v560_v5 }
 0x115   :  { %1086 = vmatmul.f32.gmra.mxu2 %v2897_v14  ;;  %v2735_v14 = vmov 0.0  }
 0x116   :  { %1153 = vmatmul.f32.gmra.mxu3 %v2904_v18 }
 0x117   :  { %v3145_v7 = vpop.f32.mrf.mxu0 }
 0x118   :  { %3503 = vst [vmem:[#allocation27_spill] sm:$0xff] %v3145_v7  ;;  %v3158_v18 = vpop.f32.mrf.mxu2 }
 0x119   :  { %v3151_v11 = vpop.f32.mrf.mxu3  ;;  %v3156_v44 = vpop.f32.mrf.mxu1 }
 0x11a   :  { %3504 = vst [vmem:[#allocation28_spill] sm:$0xff] %v3156_v44  ;;  %966 = vmatmul.f32.gmra.mxu0 %v2912_v21 }
 0x11c   :  { %1025 = vmatmul.f32.gmra.mxu1 %v2890_v12 }
 0x11d   :  { %1340 = vmatmul.f32.vlgmr.msra.gmra.mxu2 %v2735_v14 }
 0x11e   :  { %1360 = vmatmul.f32.vlgmr.msra.gmra.mxu3 %v2735_v14  ;;  %2460 = vmatpush.msk.msra.mxu2 %vm1314_vm2, %v3010_v34 }
 0x11f   :  { %v3164_v30 = vpop.f32.mrf.mxu0  ;;  %2462 = vmatpush.msk.msra.mxu3 %vm1314_vm2, %v3138_v8 }
 0x120   :  { %v3175_v25 = vpop.f32.mrf.mxu2  ;;  %1474 = vmatpush.msra.mxu2 %v3045_v35 }
 0x121   :  { %v3170_v31 = vpop.f32.mrf.mxu3  ;;  %1494 = vmatpush.msra.mxu3 %v3140_v10  ;;  %v3173_v21 = vpop.f32.mrf.mxu1 }
 0x122   :  { %1180 = vmatmul.f32.vlgmr.msra.gmra.mxu0 %v2775_v9  ;;  %1475 = vmatpush.msra.mxu2 %v3086_v42 }
 0x123   :  { %1495 = vmatpush.msra.mxu3 %v3153_v16  ;;  %2502 = vmatpush.msk.msra.mxu0 %vm1314_vm2, %v3138_v8 }
 0x124   :  { %1231 = vmatmul.f32.vlgmr.msra.gmra.mxu1 %v2775_v9 }
 0x125   :  { %2074 = vmatpush.msra.mxu0 %v3140_v10  ;;  %2506 = vmatpush.msk.msra.mxu1 %vm1314_vm2, %v2996_v55 }
 0x126   :  { %1380 = vmatmul.f32.vlgmr.msrb.gmra.mxu2 %v2735_v14 }
 0x127   :  { %v3187_v38 = vpop.f32.mrf.mxu0  ;;  %2075 = vmatpush.msra.mxu0 %v3153_v16  ;;  %2466 = vmatpush.msk.msrb.mxu2 %vm1314_vm2, %v2996_v55 }
 0x128   :  { %2150 = vmatpush.msra.mxu1 %v3022_v54  ;;  %v3197_v9 = vpop.f32.mrf.mxu2 }
 0x129   :  { %v3193_v44 = vpop.f32.mrf.mxu3  ;;  %v3195_v7 = vpop.f32.mrf.mxu1  ;;  %1570 = vmatpush.msrb.mxu2 %v3022_v54 }
 0x12a   :  { %1184 = vmatmul.f32.gmra.mxu0 %v2781_v15  ;;  %2151 = vmatpush.msra.mxu1 %v3066_v45 }
 0x12b   :  { %1571 = vmatpush.msrb.mxu2 %v3066_v45 }
 0x12c   :  { %1235 = vmatmul.f32.gmra.mxu1 %v2781_v15 }
 0x12f   :  { %v3204_v14 = vpop.f32.mrf.mxu0 }
 0x130   :  { %v3212_v58 = vpop.f32.mrf.mxu2 }
 0x131   :  { %v3206_v24 = vpop.f32.mrf.mxu3  ;;  %v3210_v2 = vpop.f32.mrf.mxu1 }
 0x132   :  { %3505 = vst [vmem:[#allocation29_spill] sm:$0xff] %v3206_v24  ;;  %1188 = vmatmul.f32.gmra.mxu0 %v2800_v29 }
 0x134   :  { %1239 = vmatmul.f32.gmra.mxu1 %v2800_v29 }
 0x137   :  { %v691_v63 = vpop.f32.mrf.mxu0 }
 0x138   :  { %v692_v36 = vadd.f32 %v691_v63, %v635_v57  ;;  %v817_v13 = vpop.f32.mrf.mxu2  ;;  %v576_v63 = vadd.f32 %v3122_v1, %v3037_v23 }
 0x139   :  { %v868_v15 = vpop.f32.mrf.mxu3  ;;  %v754_v46 = vpop.f32.mrf.mxu1 }
 0x13a   :  { %1192 = vmatmul.f32.gmra.mxu0 %v2820_v43  ;;  %v755_v62 = vadd.f32 %v754_v46, %v692_v36 }
 0x13c   :  { %v818_v39 = vadd.f32 %v817_v13, %v755_v62  ;;  %1243 = vmatmul.f32.gmra.mxu1 %v2820_v43  ;;  %v643_v43 = vadd.f32 %v3118_v60, %v576_v63  ;;  %v592_v62 = vadd.f32 %v3158_v18, %v3037_v23 }
 0x13e   :  { %v3222_v29 = vadd.f32 %v868_v15, %v818_v39 }
 0x13f   :  { %v696_v49 = vpop.f32.mrf.mxu0 }
 0x140   :  { %v697_v56 = vadd.f32 %v696_v49, %v639_v48  ;;  %v821_v59 = vpop.f32.mrf.mxu2  ;;  %v584_v49 = vadd.f32 %v3134_v0, %v3037_v23 }
 0x141   :  { %v872_v5 = vpop.f32.mrf.mxu3  ;;  %v760_v57 = vpop.f32.mrf.mxu1 }
 0x142   :  { %1196 = vmatmul.f32.gmra.mxu0 %v2838_v52  ;;  %v761_v24 = vadd.f32 %v760_v57, %v697_v56 }
 0x144   :  { %v822_v47 = vadd.f32 %v821_v59, %v761_v24  ;;  %1247 = vmatmul.f32.gmra.mxu1 %v2838_v52  ;;  %v647_v52 = vadd.f32 %v3130_v3, %v584_v49 }
 0x146   :  { %v3229_v36 = vadd.f32 %v872_v5, %v822_v47 }
 0x147   :  { %v701_v13 = vpop.f32.mrf.mxu0 }
 0x148   :  { %v702_v39 = vadd.f32 %v701_v13, %v643_v43  ;;  %v825_v50 = vpop.f32.mrf.mxu2 }
 0x149   :  { %v876_v46 = vpop.f32.mrf.mxu3  ;;  %v766_v48 = vpop.f32.mrf.mxu1 }
 0x14a   :  { %1200 = vmatmul.f32.gmra.mxu0 %v2856_v61  ;;  %v767_v51 = vadd.f32 %v766_v48, %v702_v39 }
 0x14c   :  { %v826_v1 = vadd.f32 %v825_v50, %v767_v51  ;;  %1251 = vmatmul.f32.gmra.mxu1 %v2856_v61  ;;  %v651_v61 = vadd.f32 %v3151_v11, %v592_v62 }
 0x14e   :  { %v3236_v60 = vadd.f32 %v876_v46, %v826_v1  ;;  %v3247_v46 = vperm.slane %v2953_v27, 2 }
 0x14f   :  { %v706_v24 = vpop.f32.mrf.mxu0 }
 0x150   :  { %3506 = vst [vmem:[#allocation30_spill] sm:$0xff] %v3236_v60  ;;  %v707_v47 = vadd.f32 %v706_v24, %v647_v52  ;;  %v829_v0 = vpop.f32.mrf.mxu2 }
 0x151   :  { %v880_v15 = vpop.f32.mrf.mxu3  ;;  %v772_v56 = vpop.f32.mrf.mxu1 }
 0x152   :  { %1204 = vmatmul.f32.gmra.mxu0 %v2873_v4  ;;  %v773_v5 = vadd.f32 %v772_v56, %v707_v47 }
 0x154   :  { %v830_v63 = vadd.f32 %v829_v0, %v773_v5  ;;  %1255 = vmatmul.f32.gmra.mxu1 %v2873_v4 }
 0x156   :  { %v3243_v3 = vadd.f32 %v880_v15, %v830_v63 }
 0x157   :  { %v711_v57 = vpop.f32.mrf.mxu0 }
 0x158   :  { %3507 = vst [vmem:[#allocation31_spill] sm:$0xff] %v3243_v3  ;;  %v712_v59 = vadd.f32 %v711_v57, %v651_v61  ;;  %v833_v39 = vpop.f32.mrf.mxu2 }
 0x159   :  { %v884_v43 = vpop.f32.mrf.mxu3  ;;  %v778_v13 = vpop.f32.mrf.mxu1 }
 0x15a   :  { %1208 = vmatmul.f32.gmra.mxu0 %v2890_v12  ;;  %v779_v18 = vadd.f32 %v778_v13, %v712_v59 }
 0x15c   :  { %v834_v49 = vadd.f32 %v833_v39, %v779_v18  ;;  %1259 = vmatmul.f32.gmra.mxu1 %v2890_v12 }
 0x15e   :  { %v3250_v4 = vadd.f32 %v884_v43, %v834_v49 }
 0x15f   :  { %v911_v48 = vpop.f32.mrf.mxu0 }
 0x160   :  { %3508 = vst [vmem:[#allocation32_spill] sm:$0xff] %v3250_v4  ;;  %v912_v11 = vadd.f32 %v911_v48, %v3247_v46  ;;  %v1052_v1 = vpop.f32.mrf.mxu2 }
 0x161   :  { %v1112_v50 = vpop.f32.mrf.mxu3  ;;  %v998_v51 = vpop.f32.mrf.mxu1 }
 0x162   :  { %v999_v52 = vadd.f32 %v998_v51, %v912_v11 }
 0x164   :  { %v1053_v24 = vadd.f32 %v1052_v1, %v999_v52 }
 0x166   :  { %v3253_v15 = vadd.f32 %v1112_v50, %v1053_v24 }
 0x167   :  { %v919_v47 = vpop.f32.mrf.mxu0 }
 0x168   :  { %v920_v62 = vadd.f32 %v919_v47, %v3247_v46  ;;  %v1057_v0 = vpop.f32.mrf.mxu2 }
 0x169   :  { %v1118_v27 = vpop.f32.mrf.mxu3  ;;  %v1002_v56 = vpop.f32.mrf.mxu1 }
 0x16a   :  { %v1003_v5 = vadd.f32 %v1002_v56, %v920_v62 }
 0x16c   :  { %v1058_v12 = vadd.f32 %v1057_v0, %v1003_v5 }
 0x16e   :  { %v3256_v61 = vadd.f32 %v1118_v27, %v1058_v12 }
 0x16f   :  { %v927_v63 = vpop.f32.mrf.mxu0 }
 0x170   :  { %v928_v57 = vadd.f32 %v927_v63, %v3247_v46  ;;  %v1062_v13 = vpop.f32.mrf.mxu2 }
 0x171   :  { %v1124_v59 = vpop.f32.mrf.mxu3  ;;  %v1006_v43 = vpop.f32.mrf.mxu1 }
 0x172   :  { %v1007_v39 = vadd.f32 %v1006_v43, %v928_v57 }
 0x174   :  { %v1063_v18 = vadd.f32 %v1062_v13, %v1007_v39 }
 0x176   :  { %v3259_v48 = vadd.f32 %v1124_v59, %v1063_v18 }
 0x177   :  { %v935_v49 = vpop.f32.mrf.mxu0 }
 0x178   :  { %v936_v11 = vadd.f32 %v935_v49, %v3247_v46  ;;  %v1067_v1 = vpop.f32.mrf.mxu2 }
 0x179   :  { %v1130_v50 = vpop.f32.mrf.mxu3  ;;  %v1010_v51 = vpop.f32.mrf.mxu1 }
 0x17a   :  { %v1011_v52 = vadd.f32 %v1010_v51, %v936_v11 }
 0x17c   :  { %v1068_v24 = vadd.f32 %v1067_v1, %v1011_v52 }
 0x17e   :  { %v3262_v62 = vadd.f32 %v1130_v50, %v1068_v24 }
 0x17f   :  { %v943_v47 = vpop.f32.mrf.mxu0 }
 0x180   :  { %v944_v27 = vadd.f32 %v943_v47, %v3247_v46  ;;  %v1072_v5 = vpop.f32.mrf.mxu2 }
 0x181   :  { %v1136_v56 = vpop.f32.mrf.mxu3  ;;  %v1014_v0 = vpop.f32.mrf.mxu1 }
 0x182   :  { %v1015_v12 = vadd.f32 %v1014_v0, %v944_v27 }
 0x184   :  { %v1073_v63 = vadd.f32 %v1072_v5, %v1015_v12 }
 0x186   :  { %v3265_v59 = vadd.f32 %v1136_v56, %v1073_v63  ;;  %v677_v56 = vadd.f32 %v3164_v30, %v3051_v17 }
 0x187   :  { %v951_v57 = vpop.f32.mrf.mxu0 }
 0x188   :  { %3509 = vst [vmem:[#allocation33_spill] sm:$0xff] %v3265_v59  ;;  %v952_v43 = vadd.f32 %v951_v57, %v3247_v46  ;;  %v1077_v18 = vpop.f32.mrf.mxu2  ;;  %v737_v63 = vadd.f32 %v3173_v21, %v677_v56 }
 0x189   :  { %v1142_v13 = vpop.f32.mrf.mxu3  ;;  %v1018_v39 = vpop.f32.mrf.mxu1 }
 0x18a   :  { %v1019_v49 = vadd.f32 %v1018_v39, %v952_v43 }
 0x18c   :  { %v1078_v11 = vadd.f32 %v1077_v18, %v1019_v49  ;;  %v806_v49 = vadd.f32 %v3175_v25, %v737_v63 }
 0x18e   :  { %v3268_v50 = vadd.f32 %v1142_v13, %v1078_v11  ;;  %v430_v11 = vadd.f32 %v3033_v20, %v2972_v53  ;;  %v857_v30 = vadd.f32 %v3170_v31, %v806_v49  ;;  %v3294_v49 = vld [vmem:[#allocation8 + $0x3] ss:$0 sm:$0xff] }
 0x18f   :  { %v959_v51 = vpop.f32.mrf.mxu0 }
 0x190   :  { %3510 = vst [vmem:[#allocation34_spill] sm:$0xff] %v3268_v50  ;;  %v960_v1 = vadd.f32 %v959_v51, %v3247_v46  ;;  %v1082_v47 = vpop.f32.mrf.mxu2 }
 0x191   :  { %v1148_v52 = vpop.f32.mrf.mxu3  ;;  %v1022_v24 = vpop.f32.mrf.mxu1 }
 0x192   :  { %v1023_v27 = vadd.f32 %v1022_v24, %v960_v1 }
 0x194   :  { %v1083_v0 = vadd.f32 %v1082_v47, %v1023_v27 }
 0x196   :  { %v3273_v12 = vadd.f32 %v1148_v52, %v1083_v0  ;;  %v481_v52 = vadd.f32 %v3041_v26, %v430_v11 }
 0x197   :  { %v967_v5 = vpop.f32.mrf.mxu0 }
 0x198   :  { %v968_v57 = vadd.f32 %v967_v5, %v3247_v46  ;;  %v1087_v39 = vpop.f32.mrf.mxu2 }
 0x199   :  { %v1154_v43 = vpop.f32.mrf.mxu3  ;;  %v1026_v13 = vpop.f32.mrf.mxu1 }
 0x19a   :  { %v1027_v18 = vadd.f32 %v1026_v13, %v968_v57 }
 0x19c   :  { %v1088_v51 = vadd.f32 %v1087_v39, %v1027_v18 }
 0x19e   :  { %v3280_v17 = vadd.f32 %v1154_v43, %v1088_v51 }
 0x19f   :  { %v1181_v1 = vpop.f32.mrf.mxu0 }
 0x1a0   :  { %3511 = vst [vmem:[#allocation35_spill] sm:$0xff] %v3280_v17  ;;  %v1341_v47 = vpop.f32.mrf.mxu2 }
 0x1a1   :  { %v1361_v21 = vpop.f32.mrf.mxu3  ;;  %v1232_v46 = vpop.f32.mrf.mxu1  ;;  %v1384_v27 = vadd.f32 %v1341_v47, %v481_v52 }
 0x1a2   :  { %v1404_v24 = vadd.f32 %v1361_v21, %v857_v30 }
 0x1a3   :  { %v2456_v0 = vmul.f32 -1.442695, %v1384_v27  ;;  %v1182_v27 = vadd.f32 %v1181_v1, %v3253_v15 }
 0x1a4   :  { %v2457_v56 = vmul.f32 -1.442695, %v1404_v24 }
 0x1a5   :  { %v1233_v3 = vadd.f32 %v1232_v46, %v1182_v27  ;;  %v434_v27 = vadd.f32 %v3055_v22, %v2979_v6 }
 0x1a6   :  { %2527 = vpow2.f32 %v2457_v56 }
 0x1a7   :  { %2529 = vpow2.f32 %v2456_v0  ;;  %v3284_v25 = vpop.f32.mrf.mxu0 }
 0x1a9   :  { %v3286_v53 = vpop.f32.mrf.mxu1  ;;  %v1381_v52 = vpop.f32.mrf.mxu2 }
 0x1aa   :  { %v1424_v0 = vadd.f32 %v3294_v49, %v1381_v52 }
 0x1ac   :  { %v2528_v20 = vpop.eup %2527 }
 0x1ad   :  { %v2530_v5 = vpop.eup %2529  ;;  %v1408_v63 = vadd.f32 1.0, %v2528_v20 }
 0x1ae   :  { %v1388_v57 = vadd.f32 1.0, %v2530_v5 }
 0x1af   :  { %v3288_v31 = vpop.f32.mrf.mxu0  ;;  %v1420_v1 = vand.u32 2147483648, %v1408_v63  ;;  %vm1414_vm8 = vweird.f32 %v1408_v63 }
 0x1b0   :  { %2531 = vrcp.f32 %v1388_v57  ;;  %v1400_v21 = vand.u32 2147483648, %v1388_v57  ;;  %v1398_v47 = vand.u32 2147483647, %v1388_v57  ;;  %vm1394_vm4 = vweird.f32 %v1388_v57 }
 0x1b1   :  { %2533 = vrcp.f32 %v1408_v63  ;;  %v3290_v26 = vpop.f32.mrf.mxu1 }
 0x1b2   :  { %v1401_v5 = vor.u32 1.1754944e-38, %v1400_v21  ;;  %vm1399_vm6 = vcmp.eq.f32.partialorder %v1398_v47, 8.507059e+37 }
 0x1b6   :  { %v2532_v43 = vpop.eup %2531 }
 0x1b7   :  { %v2534_v13 = vpop.eup %2533  ;;  %v3292_v39 = vpop.f32.mrf.mxu0  ;;  %v1390_v18 = vmul.f32 %v2532_v43, %v1388_v57  ;;  %vm1395_vm3 = vweird.f32 %v2532_v43 }
 0x1b8   :  { %v1410_v51 = vmul.f32 %v2534_v13, %v1408_v63  ;;  %vm1396_vm5 = vmor %vm1394_vm4, %vm1395_vm3  ;;  %vm1415_vm7 = vweird.f32 %v2534_v13 }
 0x1b9   :  { %v1391_v11 = vsub.f32 1.0, %v1390_v18  ;;  %v3296_v30 = vpop.f32.mrf.mxu1  ;;  %vm1416_vm9 = vmor %vm1414_vm8, %vm1415_vm7 }
 0x1ba   :  { %v1411_v20 = vsub.f32 1.0, %v1410_v51  ;;  %v1418_v51 = vand.u32 2147483647, %v1408_v63 }
 0x1bb   :  { %v1392_v24 = vmul.f32 %v2532_v43, %v1391_v11 }
 0x1bc   :  { %v1412_v60 = vmul.f32 %v2534_v13, %v1411_v20  ;;  %vm1419_vm10 = vcmp.eq.f32.partialorder %v1418_v51, 8.507059e+37 }
 0x1bd   :  { %v1393_v56 = vadd.f32 %v2532_v43, %v1392_v24 }
 0x1be   :  { %v1413_v15 = vadd.f32 %v2534_v13, %v1412_v60 }
 0x1bf   :  { %v1397_v17 = vsel %vm1396_vm5, %v2532_v43, %v1393_v56  ;;  %v3300_v18 = vpop.f32.mrf.mxu0 }
 0x1c0   :  { %v1402_v4 = vsel %vm1399_vm6, %v1401_v5, %v1397_v17  ;;  %v1417_v43 = vsel %vm1416_vm9, %v2534_v13, %v1413_v15  ;;  %v1421_v17 = vor.u32 1.1754944e-38, %v1420_v1 }
 0x1c1   :  { %v1425_v50 = vmul.f32 %v1424_v0, %v1402_v4  ;;  %v3302_v11 = vpop.f32.mrf.mxu1  ;;  %v485_v0 = vadd.f32 %v3060_v37, %v434_v27 }
 0x1c2   :  { %v1422_v46 = vsel %vm1419_vm10, %v1421_v17, %v1417_v43 }
 0x1c3   :  { %v1426_v59 = vadd.f32 %v1425_v50, %v1233_v3 }
 0x1c5   :  { %2535 = vtanh.f32 %v1426_v59 }
 0x1c7   :  { %v3304_v57 = vpop.f32.mrf.mxu0 }
 0x1c9   :  { %v3306_v52 = vpop.f32.mrf.mxu1 }
 0x1cb   :  { %v2536_v21 = vpop.eup %2535 }
 0x1cc   :  { %v1428_v4 = vsub.f32 0.0, %v2536_v21 }
 0x1ce   :  { %v1429_v24 = vmul.f32 %v1428_v4, %v1422_v46 }
 0x1cf   :  { %v1205_v47 = vpop.f32.mrf.mxu0 }
 0x1d0   :  { %v3308_v3 = vadd.f32 %v2536_v21, %v1429_v24  ;;  %v1206_v60 = vadd.f32 %v1205_v47, %v3273_v12  ;;  %v627_v12 = vadd.f32 %v3058_v32, %v3064_v40  ;;  %v1186_v47 = vadd.f32 %v3284_v25, %v3256_v61 }
 0x1d1   :  { %v1256_v59 = vpop.f32.mrf.mxu1 }
 0x1d2   :  { %2459 = vmatmul.msk.f32.vlgmr.msrb.gmra.mxu3 %vm1310_vm11, %v3308_v3  ;;  %2461 = vmatmul.msk.f32.vlgmr.msra.gmra.mxu2 %vm1310_vm11, %v3308_v3  ;;  %v3315_v50 = vadd.f32 %v1256_v59, %v1206_v60  ;;  %v682_v63 = vadd.f32 %v3187_v38, %v627_v12 }
 0x1d3   :  { %2468 = vmatpush.msk.msrb.mxu3 %vm1314_vm2, %v3010_v34  ;;  %2470 = vmatpush.msk.msra.mxu2 %vm1314_vm2, %v3138_v8 }
 0x1d4   :  { %v743_v13 = vadd.f32 %v3195_v7, %v682_v63 }
 0x1d5   :  { %1590 = vmatpush.msrb.mxu3 %v3045_v35  ;;  %1610 = vmatpush.msra.mxu2 %v3140_v10 }
 0x1d6   :  { %v810_v56 = vadd.f32 %v3197_v9, %v743_v13 }
 0x1d7   :  { %1591 = vmatpush.msrb.mxu3 %v3086_v42  ;;  %1611 = vmatpush.msra.mxu2 %v3153_v16 }
 0x1d8   :  { %v861_v20 = vadd.f32 %v3193_v44, %v810_v56  ;;  %v1237_v56 = vadd.f32 %v3286_v53, %v1186_v47  ;;  %v552_v53 = vadd.f32 %v3078_v41, %v3037_v23 }
 0x1da   :  { %2463 = vmatmul.msk.f32.vlgmr.msra.gmra.mxu3 %vm1310_vm11, %v3308_v3 }
 0x1db   :  { %2474 = vmatpush.msk.msra.mxu3 %vm1314_vm2, %v2996_v55 }
 0x1dd   :  { %1686 = vmatpush.msra.mxu3 %v3022_v54 }
 0x1df   :  { %1687 = vmatpush.msra.mxu3 %v3066_v45 }
 0x255   :  { %v1457_v5 = vpop.f32.mrf.mxu3  ;;  %v1477_v15 = vpop.f32.mrf.mxu2 }
 0x256   :  { %v1500_v1 = vadd.f32 %v1457_v5, %v485_v0  ;;  %v1520_v51 = vadd.f32 %v1477_v15, %v861_v20 }
 0x258   :  { %v2464_v43 = vmul.f32 -1.442695, %v1500_v1  ;;  %v2465_v21 = vmul.f32 -1.442695, %v1520_v51 }
 0x25a   :  { %2537 = vpow2.f32 %v2464_v43 }
 0x25b   :  { %2539 = vpow2.f32 %v2465_v21 }
 0x25d   :  { %v1497_v24 = vpop.f32.mrf.mxu3 }
 0x25e   :  { %v1540_v13 = vadd.f32 %v3294_v49, %v1497_v24 }
 0x260   :  { %v2538_v32 = vpop.eup %2537 }
 0x261   :  { %v2540_v40 = vpop.eup %2539  ;;  %v1504_v7 = vadd.f32 1.0, %v2538_v32 }
 0x262   :  { %v1524_v38 = vadd.f32 1.0, %v2540_v40 }
 0x263   :  { %2541 = vrcp.f32 %v1504_v7  ;;  %v1516_v44 = vand.u32 2147483648, %v1504_v7  ;;  %v1514_v46 = vand.u32 2147483647, %v1504_v7  ;;  %vm1510_vm13 = vweird.f32 %v1504_v7 }
 0x264   :  { %2543 = vrcp.f32 %v1524_v38  ;;  %v1536_v1 = vand.u32 2147483648, %v1524_v38  ;;  %vm1530_vm1 = vweird.f32 %v1524_v38  ;;  %v1534_v61 = vand.u32 2147483647, %v1524_v38 }
 0x265   :  { %v1517_v12 = vor.u32 1.1754944e-38, %v1516_v44  ;;  %vm1515_vm15 = vcmp.eq.f32.partialorder %v1514_v46, 8.507059e+37 }
 0x266   :  { %v1537_v43 = vor.u32 1.1754944e-38, %v1536_v1  ;;  %vm1535_vm4 = vcmp.eq.f32.partialorder %v1534_v61, 8.507059e+37 }
 0x269   :  { %v2542_v6 = vpop.eup %2541 }
 0x26a   :  { %v2544_v22 = vpop.eup %2543  ;;  %v1506_v9 = vmul.f32 %v2542_v6, %v1504_v7  ;;  %vm1511_vm12 = vweird.f32 %v2542_v6 }
 0x26b   :  { %v1526_v17 = vmul.f32 %v2544_v22, %v1524_v38  ;;  %vm1512_vm14 = vmor %vm1510_vm13, %vm1511_vm12  ;;  %vm1531_vm0 = vweird.f32 %v2544_v22 }
 0x26c   :  { %v1507_v37 = vsub.f32 1.0, %v1506_v9  ;;  %vm1532_vm3 = vmor %vm1530_vm1, %vm1531_vm0 }
 0x26d   :  { %v1527_v59 = vsub.f32 1.0, %v1526_v17  ;;  %v3513_v17 = vld [vmem:[#allocation29_spill] sm:$0xff] }
 0x26e   :  { %v1508_v4 = vmul.f32 %v2542_v6, %v1507_v37  ;;  %v3512_v37 = vld [vmem:[#allocation18_spill] sm:$0xff] }
 0x26f   :  { %v1528_v20 = vmul.f32 %v2544_v22, %v1527_v59 }
 0x270   :  { %v1509_v60 = vadd.f32 %v2542_v6, %v1508_v4 }
 0x271   :  { %v1529_v15 = vadd.f32 %v2544_v22, %v1528_v20 }
 0x272   :  { %v1513_v63 = vsel %vm1512_vm14, %v2542_v6, %v1509_v60 }
 0x273   :  { %v1518_v27 = vsel %vm1515_vm15, %v1517_v12, %v1513_v63  ;;  %v1533_v25 = vsel %vm1532_vm3, %v2544_v22, %v1529_v15  ;;  %v438_v22 = vadd.f32 %v3071_v28, %v2986_v33 }
 0x274   :  { %v1541_v0 = vmul.f32 %v1540_v13, %v1518_v27  ;;  %v1538_v32 = vsel %vm1535_vm4, %v1537_v43, %v1533_v25 }
 0x276   :  { %v1542_v5 = vadd.f32 %v1541_v0, %v1237_v56  ;;  %v1190_v0 = vadd.f32 %v3288_v31, %v3259_v48 }
 0x278   :  { %2545 = vtanh.f32 %v1542_v5 }
 0x27e   :  { %v2546_v51 = vpop.eup %2545 }
 0x27f   :  { %v1544_v21 = vsub.f32 %v3308_v3, %v2546_v51  ;;  %v631_v3 = vadd.f32 %v3074_v19, %v552_v53 }
 0x281   :  { %v1545_v40 = vmul.f32 %v1544_v21, %v1538_v32  ;;  %v687_v38 = vadd.f32 %v3204_v14, %v631_v3 }
 0x283   :  { %v3345_v7 = vadd.f32 %v2546_v51, %v1545_v40  ;;  %v749_v6 = vadd.f32 %v3210_v2, %v687_v38  ;;  %v1241_v51 = vadd.f32 %v3290_v26, %v1190_v0  ;;  %v2613_v26 = vld [vmem:[#allocation7 + $0x40] sm:$0xf] }
 0x285   :  { %2467 = vmatmul.msk.f32.vlgmr.msrb.gmra.mxu2 %vm1310_vm11, %v3345_v7  ;;  %2469 = vmatmul.msk.f32.vlgmr.msrb.gmra.mxu3 %vm1310_vm11, %v3345_v7  ;;  %v814_v9 = vadd.f32 %v3212_v58, %v749_v6 }
 0x286   :  { %2476 = vmatpush.msk.msrb.mxu2 %vm1314_vm2, %v3010_v34  ;;  %2478 = vmatpush.msk.msrb.mxu3 %vm1314_vm2, %v3138_v8 }
 0x287   :  { %v865_v44 = vadd.f32 %v3513_v17, %v814_v9 }
 0x288   :  { %1706 = vmatpush.msrb.mxu2 %v3045_v35  ;;  %1726 = vmatpush.msrb.mxu3 %v3140_v10 }
 0x28a   :  { %1707 = vmatpush.msrb.mxu2 %v3086_v42  ;;  %1727 = vmatpush.msrb.mxu3 %v3153_v16 }
 0x28d   :  { %2471 = vmatmul.msk.f32.vlgmr.msra.gmra.mxu2 %vm1310_vm11, %v3345_v7 }
 0x28e   :  { %2482 = vmatpush.msk.msra.mxu2 %vm1314_vm2, %v2996_v55  ;;  %v489_v55 = vadd.f32 %v3512_v37, %v438_v22 }
 0x290   :  { %1802 = vmatpush.msra.mxu2 %v3022_v54 }
 0x292   :  { %1803 = vmatpush.msra.mxu2 %v3066_v45 }
 0x308   :  { %v1573_v4 = vpop.f32.mrf.mxu2  ;;  %v1593_v46 = vpop.f32.mrf.mxu3 }
 0x309   :  { %v1616_v24 = vadd.f32 %v1573_v4, %v489_v55  ;;  %v1636_v47 = vadd.f32 %v1593_v46, %v865_v44 }
 0x30b   :  { %v2472_v23 = vmul.f32 -1.442695, %v1616_v24  ;;  %v2473_v41 = vmul.f32 -1.442695, %v1636_v47 }
 0x30d   :  { %2547 = vpow2.f32 %v2472_v23 }
 0x30e   :  { %2549 = vpow2.f32 %v2473_v41 }
 0x310   :  { %v1613_v56 = vpop.f32.mrf.mxu2 }
 0x311   :  { %v1656_v61 = vadd.f32 %v3294_v49, %v1613_v56 }
 0x313   :  { %v2548_v19 = vpop.eup %2547 }
 0x314   :  { %v2550_v14 = vpop.eup %2549  ;;  %v1620_v2 = vadd.f32 1.0, %v2548_v19 }
 0x315   :  { %v1640_v60 = vadd.f32 1.0, %v2550_v14 }
 0x316   :  { %2551 = vrcp.f32 %v1620_v2  ;;  %v1632_v63 = vand.u32 2147483648, %v1620_v2  ;;  %v1630_v27 = vand.u32 2147483647, %v1620_v2  ;;  %vm1626_vm6 = vweird.f32 %v1620_v2 }
 0x317   :  { %2553 = vrcp.f32 %v1640_v60  ;;  %v1652_v53 = vand.u32 2147483648, %v1640_v60  ;;  %vm1646_vm10 = vweird.f32 %v1640_v60  ;;  %v1650_v48 = vand.u32 2147483647, %v1640_v60 }
 0x318   :  { %v1633_v15 = vor.u32 1.1754944e-38, %v1632_v63  ;;  %vm1631_vm8 = vcmp.eq.f32.partialorder %v1630_v27, 8.507059e+37 }
 0x319   :  { %v1653_v38 = vor.u32 1.1754944e-38, %v1652_v53  ;;  %vm1651_vm13 = vcmp.eq.f32.partialorder %v1650_v48, 8.507059e+37  ;;  %v2615_v53 = vld [vmem:[#allocation7 + $0x20] sm:$0xff]  ;;  %v2616_v48 = vld [vmem:[#allocation7 + $0x28] sm:$0xff] }
 0x31c   :  { %v2552_v33 = vpop.eup %2551 }
 0x31d   :  { %v2554_v58 = vpop.eup %2553  ;;  %v1622_v28 = vmul.f32 %v2552_v33, %v1620_v2  ;;  %vm1627_vm5 = vweird.f32 %v2552_v33 }
 0x31e   :  { %v1642_v12 = vmul.f32 %v2554_v58, %v1640_v60  ;;  %vm1628_vm7 = vmor %vm1626_vm6, %vm1627_vm5  ;;  %vm1647_vm9 = vweird.f32 %v2554_v58 }
 0x31f   :  { %v1623_v59 = vsub.f32 1.0, %v1622_v28  ;;  %vm1648_vm12 = vmor %vm1646_vm10, %vm1647_vm9  ;;  %v1194_v28 = vadd.f32 %v3292_v39, %v3262_v62 }
 0x320   :  { %v1643_v5 = vsub.f32 1.0, %v1642_v12 }
 0x321   :  { %v1624_v13 = vmul.f32 %v2552_v33, %v1623_v59  ;;  %v1245_v0 = vadd.f32 %v3296_v30, %v1194_v28  ;;  %v2614_v30 = vld [vmem:[#allocation7 + $0x48] sm:$0xf] }
 0x322   :  { %v1644_v21 = vmul.f32 %v2554_v58, %v1643_v5 }
 0x323   :  { %v1625_v20 = vadd.f32 %v2552_v33, %v1624_v13 }
 0x324   :  { %v1645_v40 = vadd.f32 %v2554_v58, %v1644_v21 }
 0x325   :  { %v1629_v1 = vsel %vm1628_vm7, %v2552_v33, %v1625_v20 }
 0x326   :  { %v1634_v25 = vsel %vm1631_vm8, %v1633_v15, %v1629_v1  ;;  %v1649_v31 = vsel %vm1648_vm12, %v2554_v58, %v1645_v40 }
 0x327   :  { %v1657_v43 = vmul.f32 %v1656_v61, %v1634_v25  ;;  %v1654_v22 = vsel %vm1651_vm13, %v1653_v38, %v1649_v31  ;;  %v2617_v31 = vld [vmem:[#allocation7] sm:$0xff]  ;;  %v3517_v38 = vld [vmem:[#allocation14_spill] sm:$0xff] }
 0x329   :  { %v1658_v32 = vadd.f32 %v1657_v43, %v1241_v51 }
 0x32b   :  { %2555 = vtanh.f32 %v1658_v32 }
 0x331   :  { %v2556_v3 = vpop.eup %2555 }
 0x332   :  { %v1660_v6 = vsub.f32 %v3345_v7, %v2556_v3 }
 0x334   :  { %v1661_v9 = vmul.f32 %v1660_v6, %v1654_v22  ;;  %v3518_v6 = vld [vmem:[#allocation21_spill] sm:$0xff] }
 0x335   :  { %v446_v22 = vadd.f32 %v3518_v6, %v3517_v38 }
 0x336   :  { %v3380_v37 = vadd.f32 %v2556_v3, %v1661_v9  ;;  %v2618_v3 = vld [vmem:[#allocation7 + $0x8] sm:$0xff] }
 0x337   :  { %v3519_v9 = vld [vmem:[#allocation22_spill] sm:$0xff] }
 0x338   :  { %2475 = vmatmul.msk.f32.vlgmr.msra.gmra.mxu3 %vm1310_vm11, %v3380_v37  ;;  %2477 = vmatmul.msk.f32.vlgmr.msrb.gmra.mxu2 %vm1310_vm11, %v3380_v37 }
 0x339   :  { %2484 = vmatpush.msk.msra.mxu3 %vm1314_vm2, %v3010_v34  ;;  %2486 = vmatpush.msk.msrb.mxu2 %vm1314_vm2, %v3138_v8  ;;  %v3514_v34 = vld [vmem:[#allocation13_spill] sm:$0xff]  ;;  %v3515_v8 = vld [vmem:[#allocation19_spill] sm:$0xff] }
 0x33a   :  { %v442_v7 = vadd.f32 %v3515_v8, %v3514_v34 }
 0x33b   :  { %1822 = vmatpush.msra.mxu3 %v3045_v35  ;;  %1842 = vmatpush.msrb.mxu2 %v3140_v10  ;;  %v3516_v35 = vld [vmem:[#allocation20_spill] sm:$0xff] }
 0x33c   :  { %v493_v55 = vadd.f32 %v3516_v35, %v442_v7 }
 0x33d   :  { %1823 = vmatpush.msra.mxu3 %v3086_v42  ;;  %1843 = vmatpush.msrb.mxu2 %v3153_v16 }
 0x340   :  { %2479 = vmatmul.msk.f32.vlgmr.msrb.gmra.mxu3 %vm1310_vm11, %v3380_v37 }
 0x341   :  { %2490 = vmatpush.msk.msrb.mxu3 %vm1314_vm2, %v2613_v26 }
 0x343   :  { %1918 = vmatpush.msrb.mxu3 %v3022_v54 }
 0x345   :  { %1919 = vmatpush.msrb.mxu3 %v3066_v45 }
 0x3bb   :  { %v1689_v10 = vpop.f32.mrf.mxu3  ;;  %v1709_v17 = vpop.f32.mrf.mxu2 }
 0x3bc   :  { %v1732_v44 = vadd.f32 %v1689_v10, %v493_v55  ;;  %v1752_v16 = vadd.f32 %v1709_v17, %v3222_v29 }
 0x3be   :  { %v2480_v4 = vmul.f32 -1.442695, %v1732_v44  ;;  %v2481_v46 = vmul.f32 -1.442695, %v1752_v16 }
 0x3c0   :  { %2557 = vpow2.f32 %v2480_v4 }
 0x3c1   :  { %2559 = vpow2.f32 %v2481_v46 }
 0x3c3   :  { %v1729_v29 = vpop.f32.mrf.mxu3 }
 0x3c4   :  { %v1772_v27 = vadd.f32 %v3294_v49, %v1729_v29 }
 0x3c6   :  { %v2558_v24 = vpop.eup %2557 }
 0x3c7   :  { %v2560_v47 = vpop.eup %2559  ;;  %v1736_v23 = vadd.f32 1.0, %v2558_v24 }
 0x3c8   :  { %v1756_v54 = vadd.f32 1.0, %v2560_v47 }
 0x3c9   :  { %2561 = vrcp.f32 %v1736_v23  ;;  %v1748_v60 = vand.u32 2147483648, %v1736_v23  ;;  %v1746_v58 = vand.u32 2147483647, %v1736_v23  ;;  %vm1742_vm15 = vweird.f32 %v1736_v23 }
 0x3ca   :  { %2563 = vrcp.f32 %v1756_v54  ;;  %v1768_v61 = vand.u32 2147483648, %v1756_v54  ;;  %vm1762_vm4 = vweird.f32 %v1756_v54  ;;  %v1766_v62 = vand.u32 2147483647, %v1756_v54 }
 0x3cb   :  { %v1749_v63 = vor.u32 1.1754944e-38, %v1748_v60  ;;  %vm1747_vm1 = vcmp.eq.f32.partialorder %v1746_v58, 8.507059e+37 }
 0x3cc   :  { %v1769_v51 = vor.u32 1.1754944e-38, %v1768_v61  ;;  %vm1767_vm6 = vcmp.eq.f32.partialorder %v1766_v62, 8.507059e+37  ;;  %v2620_v62 = vld [vmem:[#allocation7 + $0x30] sm:$0xff] }
 0x3cf   :  { %v2562_v45 = vpop.eup %2561 }
 0x3d0   :  { %v2564_v41 = vpop.eup %2563  ;;  %v1738_v19 = vmul.f32 %v2562_v45, %v1736_v23  ;;  %vm1743_vm14 = vweird.f32 %v2562_v45 }
 0x3d1   :  { %v1758_v2 = vmul.f32 %v2564_v41, %v1756_v54  ;;  %vm1744_vm0 = vmor %vm1742_vm15, %vm1743_vm14  ;;  %vm1763_vm3 = vweird.f32 %v2564_v41 }
 0x3d2   :  { %v1739_v14 = vsub.f32 1.0, %v1738_v19  ;;  %vm1764_vm5 = vmor %vm1762_vm4, %vm1763_vm3 }
 0x3d3   :  { %v1759_v12 = vsub.f32 1.0, %v1758_v2 }
 0x3d4   :  { %v1740_v33 = vmul.f32 %v2562_v45, %v1739_v14 }
 0x3d5   :  { %v1760_v5 = vmul.f32 %v2564_v41, %v1759_v12 }
 0x3d6   :  { %v1741_v59 = vadd.f32 %v2562_v45, %v1740_v33 }
 0x3d7   :  { %v1761_v1 = vadd.f32 %v2564_v41, %v1760_v5 }
 0x3d8   :  { %v1745_v13 = vsel %vm1744_vm0, %v2562_v45, %v1741_v59 }
 0x3d9   :  { %v1750_v56 = vsel %vm1747_vm1, %v1749_v63, %v1745_v13  ;;  %v1765_v39 = vsel %vm1764_vm5, %v2564_v41, %v1761_v1  ;;  %v3520_v41 = vld [vmem:[#allocation33_spill] sm:$0xff] }
 0x3da   :  { %v1773_v20 = vmul.f32 %v1772_v27, %v1750_v56  ;;  %v1770_v21 = vsel %vm1767_vm6, %v1769_v51, %v1765_v39  ;;  %v1198_v19 = vadd.f32 %v3300_v18, %v3520_v41  ;;  %v2621_v39 = vld [vmem:[#allocation7 + $0x10] sm:$0xff] }
 0x3dc   :  { %v1774_v15 = vadd.f32 %v1773_v20, %v1245_v0  ;;  %v1249_v28 = vadd.f32 %v3302_v11, %v1198_v19  ;;  %v2619_v11 = vld [vmem:[#allocation7 + $0x50] sm:$0xf] }
 0x3de   :  { %2565 = vtanh.f32 %v1774_v15 }
 0x3e4   :  { %v2566_v25 = vpop.eup %2565 }
 0x3e5   :  { %v1776_v43 = vsub.f32 %v3380_v37, %v2566_v25  ;;  %v497_v37 = vadd.f32 %v3519_v9, %v446_v22 }
 0x3e7   :  { %v1777_v32 = vmul.f32 %v1776_v43, %v1770_v21  ;;  %v3521_v43 = vld [vmem:[#allocation15_spill] sm:$0xff] }
 0x3e8   :  { %v3522_v21 = vld [vmem:[#allocation23_spill] sm:$0xff] }
 0x3e9   :  { %v3408_v40 = vadd.f32 %v2566_v25, %v1777_v32  ;;  %v3438_v25 = vpop.f32.mrf.mxu0  ;;  %v450_v32 = vadd.f32 %v3522_v21, %v3521_v43 }
 0x3eb   :  { %2483 = vmatmul.msk.f32.vlgmr.msra.gmra.mxu2 %vm1310_vm11, %v3408_v40  ;;  %2485 = vmatmul.msk.f32.vlgmr.msra.gmra.mxu3 %vm1310_vm11, %v3408_v40 }
 0x3ec   :  { %2498 = vmatpush.msk.msra.mxu2 %vm1314_vm2, %v2613_v26  ;;  %2500 = vmatpush.msk.msra.mxu3 %vm1314_vm2, %v2614_v30 }
 0x3ee   :  { %2034 = vmatpush.msra.mxu2 %v2615_v53  ;;  %2054 = vmatpush.msra.mxu3 %v2616_v48 }
 0x3f0   :  { %2035 = vmatpush.msra.mxu2 %v2617_v31  ;;  %2055 = vmatpush.msra.mxu3 %v3086_v42 }
 0x3f3   :  { %2487 = vmatmul.msk.f32.vlgmr.msrb.gmra.mxu2 %vm1310_vm11, %v3408_v40 }
 0x3f4   :  { %2508 = vmatpush.msk.msrb.mxu2 %vm1314_vm2, %v2614_v30 }
 0x3f6   :  { %2170 = vmatpush.msrb.mxu2 %v2616_v48  ;;  %v3524_v48 = vld [vmem:[#allocation24_spill] sm:$0xff] }
 0x3f7   :  { %v501_v31 = vadd.f32 %v3524_v48, %v450_v32 }
 0x3f8   :  { %2171 = vmatpush.msrb.mxu2 %v2618_v3 }
 0x46e   :  { %v1805_v26 = vpop.f32.mrf.mxu2  ;;  %v1825_v34 = vpop.f32.mrf.mxu3 }
 0x46f   :  { %v1848_v8 = vadd.f32 %v1805_v26, %v497_v37  ;;  %v1868_v7 = vadd.f32 %v1825_v34, %v3229_v36  ;;  %v3444_v34 = vpop.f32.mrf.mxu1 }
 0x471   :  { %v2488_v35 = vmul.f32 -1.442695, %v1848_v8  ;;  %v2489_v42 = vmul.f32 -1.442695, %v1868_v7 }
 0x473   :  { %2567 = vpow2.f32 %v2488_v35 }
 0x474   :  { %2569 = vpow2.f32 %v2489_v42 }
 0x476   :  { %v1845_v36 = vpop.f32.mrf.mxu2 }
 0x477   :  { %v1888_v58 = vadd.f32 %v3294_v49, %v1845_v36 }
 0x479   :  { %v2568_v55 = vpop.eup %2567 }
 0x47a   :  { %v2570_v10 = vpop.eup %2569  ;;  %v1852_v17 = vadd.f32 1.0, %v2568_v55 }
 0x47b   :  { %v1872_v44 = vadd.f32 1.0, %v2570_v10 }
 0x47c   :  { %2571 = vrcp.f32 %v1852_v17  ;;  %v1864_v23 = vand.u32 2147483648, %v1852_v17  ;;  %v1862_v45 = vand.u32 2147483647, %v1852_v17  ;;  %vm1858_vm8 = vweird.f32 %v1852_v17 }
 0x47d   :  { %2573 = vrcp.f32 %v1872_v44  ;;  %v1884_v27 = vand.u32 2147483648, %v1872_v44  ;;  %vm1878_vm13 = vweird.f32 %v1872_v44  ;;  %v1882_v18 = vand.u32 2147483647, %v1872_v44 }
 0x47e   :  { %v1865_v60 = vor.u32 1.1754944e-38, %v1864_v23  ;;  %vm1863_vm10 = vcmp.eq.f32.partialorder %v1862_v45, 8.507059e+37 }
 0x47f   :  { %v1885_v20 = vor.u32 1.1754944e-38, %v1884_v27  ;;  %vm1883_vm15 = vcmp.eq.f32.partialorder %v1882_v18, 8.507059e+37  ;;  %v3527_v27 = vld [vmem:[#allocation25_spill] sm:$0xff] }
 0x482   :  { %v2572_v16 = vpop.eup %2571 }
 0x483   :  { %v2574_v4 = vpop.eup %2573  ;;  %v1854_v46 = vmul.f32 %v2572_v16, %v1852_v17  ;;  %vm1859_vm7 = vweird.f32 %v2572_v16 }
 0x484   :  { %v1874_v47 = vmul.f32 %v2574_v4, %v1872_v44  ;;  %vm1860_vm9 = vmor %vm1858_vm8, %vm1859_vm7  ;;  %vm1879_vm12 = vweird.f32 %v2574_v4 }
 0x485   :  { %v1855_v24 = vsub.f32 1.0, %v1854_v46  ;;  %vm1880_vm14 = vmor %vm1878_vm13, %vm1879_vm12 }
 0x486   :  { %v1875_v2 = vsub.f32 1.0, %v1874_v47 }
 0x487   :  { %v1856_v54 = vmul.f32 %v2572_v16, %v1855_v24 }
 0x488   :  { %v1876_v12 = vmul.f32 %v2574_v4, %v1875_v2 }
 0x489   :  { %v1857_v14 = vadd.f32 %v2572_v16, %v1856_v54 }
 0x48a   :  { %v1877_v13 = vadd.f32 %v2574_v4, %v1876_v12 }
 0x48b   :  { %v1861_v33 = vsel %vm1860_vm9, %v2572_v16, %v1857_v14 }
 0x48c   :  { %v1866_v29 = vsel %vm1863_vm10, %v1865_v60, %v1861_v33  ;;  %v1881_v56 = vsel %vm1880_vm14, %v2574_v4, %v1877_v13  ;;  %v3525_v4 = vld [vmem:[#allocation34_spill] sm:$0xff] }
 0x48d   :  { %v1889_v59 = vmul.f32 %v1888_v58, %v1866_v29  ;;  %v1886_v15 = vsel %vm1883_vm15, %v1885_v20, %v1881_v56  ;;  %v1202_v46 = vadd.f32 %v3304_v57, %v3525_v4  ;;  %v3528_v56 = vld [vmem:[#allocation26_spill] sm:$0xff] }
 0x48f   :  { %v1890_v63 = vadd.f32 %v1889_v59, %v1249_v28  ;;  %v1253_v41 = vadd.f32 %v3306_v52, %v1202_v46  ;;  %v3526_v52 = vld [vmem:[#allocation16_spill] sm:$0xff] }
 0x490   :  { %v454_v18 = vadd.f32 %v3527_v27, %v3526_v52 }
 0x491   :  { %2575 = vtanh.f32 %v1890_v63 }
 0x497   :  { %v2576_v0 = vpop.eup %2575 }
 0x498   :  { %v1892_v5 = vsub.f32 %v3408_v40, %v2576_v0  ;;  %v3523_v40 = vld [vmem:[#allocation30_spill] sm:$0xff] }
 0x49a   :  { %v1893_v1 = vmul.f32 %v1892_v5, %v1886_v15 }
 0x49c   :  { %v3429_v61 = vadd.f32 %v2576_v0, %v1893_v1  ;;  %v505_v0 = vadd.f32 %v3528_v56, %v454_v18  ;;  %v3529_v1 = vld [vmem:[#allocation31_spill] sm:$0xff] }
 0x49d   :  { %v1296_v18 = vld [vmem:[#allocation7 + $0x18] sm:$0xff] }
 0x49e   :  { %2491 = vmatmul.msk.f32.vlgmr.msrb.gmra.mxu3 %vm1310_vm11, %v3429_v61  ;;  %2493 = vmatmul.msk.f32.vlgmr.msrb.gmra.mxu0 %vm1310_vm11, %v3429_v61  ;;  %v2270_v56 = vand.u32 4294901760, %v1296_v18 }
 0x49f   :  { %2495 = vmatmul.msk.f32.vlgmr.msrb.gmra.mxu1 %vm1310_vm11, %v3429_v61  ;;  %2510 = vmatpush.msk.msrb.mxu3 %vm1314_vm2, %v2619_v11 }
 0x4a1   :  { %2190 = vmatpush.msrb.mxu3 %v2620_v62 }
 0x4a3   :  { %2191 = vmatpush.msrb.mxu3 %v2621_v39 }
 0x51b   :  { %v1941_v51 = vpop.f32.mrf.mxu0 }
 0x51c   :  { %v1984_v30 = vadd.f32 %v1941_v51, %v3523_v40  ;;  %v1961_v16 = vpop.f32.mrf.mxu1 }
 0x51d   :  { %v2004_v54 = vadd.f32 %v3294_v49, %v1961_v16 }
 0x51e   :  { %v2497_v53 = vmul.f32 -1.442695, %v1984_v30 }
 0x520   :  { %2577 = vpow2.f32 %v2497_v53 }
 0x521   :  { %v1921_v3 = vpop.f32.mrf.mxu3 }
 0x522   :  { %v1964_v38 = vadd.f32 %v1921_v3, %v501_v31 }
 0x524   :  { %v2496_v6 = vmul.f32 -1.442695, %v1964_v38 }
 0x526   :  { %2579 = vpow2.f32 %v2496_v6  ;;  %v2578_v22 = vpop.eup %2577 }
 0x527   :  { %v1988_v37 = vadd.f32 1.0, %v2578_v22 }
 0x529   :  { %v2000_v33 = vand.u32 2147483648, %v1988_v37  ;;  %vm1994_vm6 = vweird.f32 %v1988_v37  ;;  %v1998_v57 = vand.u32 2147483647, %v1988_v37 }
 0x52b   :  { %v2001_v28 = vor.u32 1.1754944e-38, %v2000_v33  ;;  %vm1999_vm8 = vcmp.eq.f32.partialorder %v1998_v57, 8.507059e+37  ;;  %v3533_v33 = vld [vmem:[#allocation32_spill] sm:$0xff] }
 0x52c   :  { %v2580_v9 = vpop.eup %2579 }
 0x52d   :  { %v1968_v26 = vadd.f32 1.0, %v2580_v9 }
 0x52f   :  { %2581 = vrcp.f32 %v1968_v26  ;;  %v1980_v10 = vand.u32 2147483648, %v1968_v26  ;;  %v1978_v44 = vand.u32 2147483647, %v1968_v26  ;;  %vm1974_vm1 = vweird.f32 %v1968_v26 }
 0x530   :  { %2583 = vrcp.f32 %v1988_v37 }
 0x531   :  { %v1981_v23 = vor.u32 1.1754944e-38, %v1980_v10  ;;  %vm1979_vm4 = vcmp.eq.f32.partialorder %v1978_v44, 8.507059e+37 }
 0x535   :  { %v2582_v8 = vpop.eup %2581 }
 0x536   :  { %v2584_v7 = vpop.eup %2583  ;;  %v1970_v35 = vmul.f32 %v2582_v8, %v1968_v26  ;;  %vm1975_vm0 = vweird.f32 %v2582_v8 }
 0x537   :  { %v1990_v55 = vmul.f32 %v2584_v7, %v1988_v37  ;;  %vm1976_vm3 = vmor %vm1974_vm1, %vm1975_vm0  ;;  %vm1995_vm5 = vweird.f32 %v2584_v7 }
 0x538   :  { %v1971_v42 = vsub.f32 1.0, %v1970_v35  ;;  %vm1996_vm7 = vmor %vm1994_vm6, %vm1995_vm5 }
 0x539   :  { %v1991_v47 = vsub.f32 1.0, %v1990_v55 }
 0x53a   :  { %v1972_v17 = vmul.f32 %v2582_v8, %v1971_v42 }
 0x53b   :  { %v1992_v14 = vmul.f32 %v2584_v7, %v1991_v47 }
 0x53c   :  { %v1973_v24 = vadd.f32 %v2582_v8, %v1972_v17 }
 0x53d   :  { %v1993_v60 = vadd.f32 %v2584_v7, %v1992_v14 }
 0x53e   :  { %v1977_v45 = vsel %vm1976_vm3, %v2582_v8, %v1973_v24 }
 0x53f   :  { %v1982_v36 = vsel %vm1979_vm4, %v1981_v23, %v1977_v45  ;;  %v1997_v58 = vsel %vm1996_vm7, %v2584_v7, %v1993_v60 }
 0x540   :  { %v2005_v19 = vmul.f32 %v2004_v54, %v1982_v36  ;;  %v2002_v12 = vsel %vm1999_vm8, %v2001_v28, %v1997_v58  ;;  %v3531_v54 = vld [vmem:[#allocation27_spill] sm:$0xff]  ;;  %v3532_v36 = vld [vmem:[#allocation28_spill] sm:$0xff] }
 0x542   :  { %v2006_v2 = vadd.f32 %v2005_v19, %v1253_v41 }
 0x544   :  { %2585 = vtanh.f32 %v2006_v2 }
 0x54a   :  { %v2586_v29 = vpop.eup %2585 }
 0x54b   :  { %v2008_v59 = vsub.f32 %v3429_v61, %v2586_v29 }
 0x54d   :  { %v2009_v63 = vmul.f32 %v2008_v59, %v2002_v12 }
 0x54f   :  { %v2010_v13 = vadd.f32 %v2586_v29, %v2009_v63  ;;  %v1298_v29 = vld [vmem:[#allocation7 + $0x58] sm:$0xf] }
 0x550   :  { %v2251_v59 = vsel %vm1314_vm2, %v1298_v29, 0 }
 0x551   :  { %2499 = vmatmul.msk.f32.vlgmr.msra.gmra.mxu2 %vm1310_vm11, %v2010_v13  ;;  %2501 = vmatmul.msk.f32.vlgmr.msra.gmra.mxu3 %vm1310_vm11, %v2010_v13  ;;  %v2266_v63 = vand.u32 4294901760, %v2251_v59 }
 0x552   :  { %2503 = vmatmul.msk.f32.vlgmr.msra.gmra.mxu0 %vm1310_vm11, %v2010_v13 }
 0x553   :  { %2359 = vmatpush.msra.mxu3 %v2266_v63  ;;  %2267 = vmatpush.msrb.mxu0 %v2266_v63  ;;  %v2295_v52 = vsub.f32 %v2251_v59, %v2266_v63 }
 0x555   :  { %2332 = vmatpush.msra.mxu2 %v2295_v52 }
 0x5cf   :  { %v2077_v6 = vpop.f32.mrf.mxu0 }
 0x5d0   :  { %v2120_v26 = vadd.f32 %v3294_v49, %v2077_v6 }
 0x5d4   :  { %v2037_v20 = vpop.f32.mrf.mxu2  ;;  %v2057_v5 = vpop.f32.mrf.mxu3 }
 0x5d5   :  { %v2080_v15 = vadd.f32 %v2037_v20, %v505_v0  ;;  %v2100_v11 = vadd.f32 %v2057_v5, %v3529_v1  ;;  %v2296_v20 = vand.u32 4294901760, %v2295_v52  ;;  %v2307_v1 = vsub.f32 %v1296_v18, %v2270_v56 }
 0x5d7   :  { %v2504_v61 = vmul.f32 -1.442695, %v2080_v15  ;;  %v2505_v62 = vmul.f32 -1.442695, %v2100_v11  ;;  %v2297_v11 = vsub.f32 %v2295_v52, %v2296_v20 }
 0x5d9   :  { %2587 = vpow2.f32 %v2504_v61 }
 0x5da   :  { %2589 = vpow2.f32 %v2505_v62 }
 0x5df   :  { %v2588_v39 = vpop.eup %2587 }
 0x5e0   :  { %v2590_v51 = vpop.eup %2589  ;;  %v2084_v43 = vadd.f32 1.0, %v2588_v39 }
 0x5e1   :  { %v2104_v21 = vadd.f32 1.0, %v2590_v51  ;;  %v2298_v51 = vand.u32 4294901760, %v2297_v11 }
 0x5e2   :  { %2591 = vrcp.f32 %v2084_v43  ;;  %v2096_v48 = vand.u32 2147483648, %v2084_v43  ;;  %v2094_v38 = vand.u32 2147483647, %v2084_v43  ;;  %vm2090_vm10 = vweird.f32 %v2084_v43 }
 0x5e3   :  { %2593 = vrcp.f32 %v2104_v21  ;;  %v2116_v17 = vand.u32 2147483648, %v2104_v21  ;;  %vm2110_vm15 = vweird.f32 %v2104_v21  ;;  %v2114_v44 = vand.u32 2147483647, %v2104_v21  ;;  %2299 = vmatpush.msrb.mxu1 %v2298_v51 }
 0x5e4   :  { %v2097_v9 = vor.u32 1.1754944e-38, %v2096_v48  ;;  %vm2095_vm13 = vcmp.eq.f32.partialorder %v2094_v38, 8.507059e+37 }
 0x5e5   :  { %v2117_v46 = vor.u32 1.1754944e-38, %v2116_v17  ;;  %vm2115_vm1 = vcmp.eq.f32.partialorder %v2114_v44, 8.507059e+37 }
 0x5e8   :  { %v2592_v32 = vpop.eup %2591 }
 0x5e9   :  { %v2594_v40 = vpop.eup %2593  ;;  %v2086_v30 = vmul.f32 %v2592_v32, %v2084_v43  ;;  %vm2091_vm9 = vweird.f32 %v2592_v32 }
 0x5ea   :  { %v2106_v31 = vmul.f32 %v2594_v40, %v2104_v21  ;;  %vm2092_vm12 = vmor %vm2090_vm10, %vm2091_vm9  ;;  %vm2111_vm14 = vweird.f32 %v2594_v40  ;;  %v2308_v21 = vand.u32 4294901760, %v2307_v1 }
 0x5eb   :  { %v2087_v53 = vsub.f32 1.0, %v2086_v30  ;;  %vm2112_vm0 = vmor %vm2110_vm15, %vm2111_vm14 }
 0x5ec   :  { %v2107_v37 = vsub.f32 1.0, %v2106_v31 }
 0x5ed   :  { %v2088_v3 = vmul.f32 %v2592_v32, %v2087_v53  ;;  %v2309_v53 = vsub.f32 %v2307_v1, %v2308_v21 }
 0x5ee   :  { %v2108_v42 = vmul.f32 %v2594_v40, %v2107_v37 }
 0x5ef   :  { %v2089_v22 = vadd.f32 %v2592_v32, %v2088_v3  ;;  %v2310_v6 = vand.u32 4294901760, %v2309_v53 }
 0x5f0   :  { %v2109_v10 = vadd.f32 %v2594_v40, %v2108_v42  ;;  %v2622_v42 = vld [vmem:[#allocation8 + $0x3] ss:$0 sm:$0xff] }
 0x5f1   :  { %v2093_v8 = vsel %vm2092_vm12, %v2592_v32, %v2089_v22  ;;  %v3534_v22 = vld [vmem:[#allocation35_spill] sm:$0xff] }
 0x5f2   :  { %v2098_v7 = vsel %vm2095_vm13, %v2097_v9, %v2093_v8  ;;  %v2113_v16 = vsel %vm2112_vm0, %v2594_v40, %v2109_v10  ;;  %v1210_v9 = vadd.f32 %v3438_v25, %v3534_v22 }
 0x5f3   :  { %v2121_v35 = vmul.f32 %v2120_v26, %v2098_v7  ;;  %v2118_v49 = vsel %vm2115_vm1, %v2117_v46, %v2113_v16 }
 0x5f4   :  { %v1261_v17 = vadd.f32 %v3444_v34, %v1210_v9 }
 0x5f5   :  { %v2122_v55 = vadd.f32 %v2121_v35, %v3315_v50  ;;  %v3530_v50 = vld [vmem:[#allocation17_spill] sm:$0xff] }
 0x5f6   :  { %v458_v45 = vadd.f32 %v3531_v54, %v3530_v50 }
 0x5f7   :  { %2595 = vtanh.f32 %v2122_v55 }
 0x5f8   :  { %v509_v41 = vadd.f32 %v3532_v36, %v458_v45 }
 0x5fd   :  { %v2596_v4 = vpop.eup %2595 }
 0x5fe   :  { %v2124_v24 = vsub.f32 %v2010_v13, %v2596_v4  ;;  %v1297_v13 = vld [vmem:[#allocation7 + $0x38] sm:$0xff] }
 0x5ff   :  { %v2268_v27 = vand.u32 4294901760, %v1297_v13 }
 0x600   :  { %v2125_v47 = vmul.f32 %v2124_v24, %v2118_v49 }
 0x601   :  { %v2301_v5 = vsub.f32 %v1297_v13, %v2268_v27  ;;  %2361 = vmatpush.msra.mxu3 %v2268_v27  ;;  %2269 = vmatpush.msrb.mxu0 %v2268_v27 }
 0x602   :  { %v3460_v23 = vadd.f32 %v2596_v4, %v2125_v47 }
 0x603   :  { %v2302_v61 = vand.u32 4294901760, %v2301_v5  ;;  %2335 = vmatpush.msra.mxu2 %v2301_v5  ;;  %2363 = vmatpush.msra.mxu3 %v2270_v56 }
 0x604   :  { %2507 = vmatmul.msk.f32.vlgmr.msra.gmra.mxu1 %vm1310_vm11, %v3460_v23  ;;  %2509 = vmatmul.msk.f32.vlgmr.msrb.gmra.mxu2 %vm1310_vm11, %v3460_v23 }
 0x605   :  { %2511 = vmatmul.msk.f32.vlgmr.msrb.gmra.mxu3 %vm1310_vm11, %v3460_v23  ;;  %2271 = vmatpush.msrb.mxu0 %v2270_v56  ;;  %v2303_v43 = vsub.f32 %v2301_v5, %v2302_v61 }
 0x606   :  { %2338 = vmatpush.msra.mxu2 %v2307_v1 }
 0x607   :  { %2387 = vmatpush.msra.mxu0 %v2296_v20  ;;  %v2304_v40 = vand.u32 4294901760, %v2303_v43 }
 0x609   :  { %2391 = vmatpush.msra.mxu0 %v2302_v61  ;;  %2305 = vmatpush.msrb.mxu1 %v2304_v40 }
 0x60b   :  { %2395 = vmatpush.msra.mxu0 %v2308_v21  ;;  %2311 = vmatpush.msrb.mxu1 %v2310_v6 }
 0x60d   :  { %2415 = vmatpush.msra.mxu1 %v2266_v63 }
 0x60f   :  { %2417 = vmatpush.msra.mxu1 %v2268_v27 }
 0x611   :  { %2419 = vmatpush.msra.mxu1 %v2270_v56 }
 0x681   :  { %v2153_v19 = vpop.f32.mrf.mxu1 }
 0x682   :  { %v2196_v14 = vadd.f32 %v2153_v19, %v509_v41 }
 0x684   :  { %v2512_v2 = vmul.f32 -1.442695, %v2196_v14 }
 0x686   :  { %2597 = vpow2.f32 %v2512_v2 }
 0x687   :  { %v2173_v60 = vpop.f32.mrf.mxu2 }
 0x688   :  { %v2216_v57 = vadd.f32 %v2173_v60, %v3533_v33  ;;  %v2193_v38 = vpop.f32.mrf.mxu3 }
 0x689   :  { %v2236_v55 = vadd.f32 %v2622_v42, %v2193_v38 }
 0x68a   :  { %v2513_v58 = vmul.f32 -1.442695, %v2216_v57 }
 0x68c   :  { %v2598_v28 = vpop.eup %2597  ;;  %2599 = vpow2.f32 %v2513_v58  ;;  %v2526_v58 = vld [vmem:[#allocation8 + $0x4] ss:$0 sm:$0xff] }
 0x68d   :  { %v2200_v12 = vadd.f32 1.0, %v2598_v28 }
 0x68f   :  { %2601 = vrcp.f32 %v2200_v12  ;;  %v2212_v30 = vand.u32 2147483648, %v2200_v12  ;;  %v2210_v31 = vand.u32 2147483647, %v2200_v12  ;;  %vm2206_vm3 = vweird.f32 %v2200_v12 }
 0x691   :  { %v2213_v8 = vor.u32 1.1754944e-38, %v2212_v30  ;;  %vm2211_vm5 = vcmp.eq.f32.partialorder %v2210_v31, 8.507059e+37 }
 0x692   :  { %v2600_v0 = vpop.eup %2599 }
 0x693   :  { %v2220_v15 = vadd.f32 1.0, %v2600_v0 }
 0x695   :  { %v2602_v62 = vpop.eup %2601  ;;  %2603 = vrcp.f32 %v2220_v15  ;;  %v2232_v46 = vand.u32 2147483648, %v2220_v15  ;;  %vm2226_vm7 = vweird.f32 %v2220_v15  ;;  %v2230_v24 = vand.u32 2147483647, %v2220_v15 }
 0x696   :  { %v2202_v39 = vmul.f32 %v2602_v62, %v2200_v12  ;;  %vm2207_vm2 = vweird.f32 %v2602_v62 }
 0x697   :  { %vm2208_vm4 = vmor %vm2206_vm3, %vm2207_vm2  ;;  %v2233_v50 = vor.u32 1.1754944e-38, %v2232_v46  ;;  %vm2231_vm9 = vcmp.eq.f32.partialorder %v2230_v24, 8.507059e+37 }
 0x698   :  { %v2203_v32 = vsub.f32 1.0, %v2202_v39 }
 0x69a   :  { %v2204_v48 = vmul.f32 %v2602_v62, %v2203_v32 }
 0x69b   :  { %v2604_v3 = vpop.eup %2603 }
 0x69c   :  { %v2222_v37 = vmul.f32 %v2604_v3, %v2220_v15  ;;  %v2205_v26 = vadd.f32 %v2602_v62, %v2204_v48  ;;  %vm2227_vm6 = vweird.f32 %v2604_v3 }
 0x69d   :  { %vm2228_vm8 = vmor %vm2226_vm7, %vm2227_vm6 }
 0x69e   :  { %v2223_v7 = vsub.f32 1.0, %v2222_v37  ;;  %v2209_v35 = vsel %vm2208_vm4, %v2602_v62, %v2205_v26 }
 0x69f   :  { %v2214_v10 = vsel %vm2211_vm5, %v2213_v8, %v2209_v35 }
 0x6a0   :  { %v2237_v44 = vmul.f32 %v2236_v55, %v2214_v10  ;;  %v2224_v16 = vmul.f32 %v2604_v3, %v2223_v7 }
 0x6a2   :  { %v2238_v4 = vadd.f32 %v2237_v44, %v1261_v17  ;;  %v2225_v25 = vadd.f32 %v2604_v3, %v2224_v16 }
 0x6a4   :  { %2605 = vtanh.f32 %v2238_v4  ;;  %v2229_v49 = vsel %vm2228_vm8, %v2604_v3, %v2225_v25 }
 0x6a5   :  { %v2234_v45 = vsel %vm2231_vm9, %v2233_v50, %v2229_v49 }
 0x6aa   :  { %v2606_v47 = vpop.eup %2605 }
 0x6ab   :  { %v2240_v54 = vsub.f32 %v3460_v23, %v2606_v47 }
 0x6ad   :  { %v2241_v34 = vmul.f32 %v2240_v54, %v2234_v45 }
 0x6af   :  { %v2242_v36 = vadd.f32 %v2606_v47, %v2241_v34 }
 0x6b1   :  { %2607 = vtanh.f32 %v2242_v36 }
 0x6b7   :  { %v2608_v41 = vpop.eup %2607 }
 0x6b8   :  { %v2248_v19 = vsel %vm1310_vm11, %v2608_v41, 0  ;;  %vm2425_vm11 = vcmask 15360  }
 0x6b9   :  { %v2272_v14 = vand.u32 4294901760, %v2248_v19 }
 0x6bb   :  { %2313 = vmatmul.f32.vlgmr.msrb.gmra.mxu1 %v2272_v14  ;;  %v2273_v2 = vsub.f32 %v2248_v19, %v2272_v14 }
 0x6bd   :  { %2341 = vmatmul.f32.vlgmr.msra.gmra.mxu2 %v2273_v2  ;;  %v2274_v60 = vand.u32 4294901760, %v2273_v2 }
 0x6bf   :  { %2367 = vmatmul.f32.vlgmr.msra.gmra.mxu3 %v2274_v60  ;;  %v2275_v33 = vsub.f32 %v2273_v2, %v2274_v60 }
 0x6c1   :  { %v2276_v57 = vand.u32 4294901760, %v2275_v33 }
 0x6c3   :  { %2277 = vmatmul.f32.vlgmr.msrb.gmra.mxu0 %v2276_v57  ;;  %2421 = vmatmul.f32.vlgmr.msra.gmra.mxu1 %v2272_v14 }
 0x6cb   :  { %2397 = vmatmul.f32.vlgmr.msra.gmra.mxu0 %v2272_v14 }
 0x738   :  { %v2314_v23 = vpop.f32.mrf.mxu1 }
 0x740   :  { %v2278_v29 = vpop.f32.mrf.mxu0  ;;  %v2342_v12 = vpop.f32.mrf.mxu2 }
 0x741   :  { %v2279_v28 = vadd.f32 %v2526_v58, %v2278_v29  ;;  %v2422_v56 = vpop.f32.mrf.mxu1 }
 0x742   :  { %v2368_v13 = vpop.f32.mrf.mxu3 }
 0x743   :  { %v2315_v59 = vadd.f32 %v2314_v23, %v2279_v28 }
 0x745   :  { %v2343_v63 = vadd.f32 %v2342_v12, %v2315_v59 }
 0x747   :  { %v2369_v52 = vadd.f32 %v2368_v13, %v2343_v63 }
 0x748   :  { %v2398_v27 = vpop.f32.mrf.mxu0 }
 0x749   :  { %v2399_v18 = vadd.f32 %v2398_v27, %v2369_v52 }
 0x74b   :  { %v2423_v0 = vadd.f32 %v2422_v56, %v2399_v18 }
 0x74d   :  { %v2426_v20 = vsel %vm2425_vm11, %v2423_v0, -inf }
 0x74e   :  { %2427 = vmax.xlane.f32.xlu0 %v2426_v20 }
 0x7c1   :  { %v2428_v5 = vpop.xlane.xlu0 %2427 }
 0x7c2   :  { %v2429_v15 = vsub.f32 %v2423_v0, %v2428_v5 }
 0x7c4   :  { %v2430_v1 = vmul.f32 1.442695, %v2429_v15 }
 0x7c6   :  { %2609 = vpow2.f32 %v2430_v1 }
 0x7cc   :  { %v2610_v11 = vpop.eup %2609 }
 0x7cd   :  { %v2432_v61 = vsel %vm2425_vm11, %v2610_v11, 0.0 }
 0x7ce   :  { %2433 = vadd.xlane.f32.xlu0 %v2432_v61 }
 0x841   :  { %v2434_v62 = vpop.xlane.xlu0 %2433 }
 0x842   :  { %2611 = vlog2.f32 %v2434_v62 }
 0x848   :  { %v2612_v39 = vpop.eup %2611 }
 0x849   :  { %v2436_v51 = vmul.f32 0.6931472, %v2612_v39 }
 0x84b   :  { %v2437_v43 = vsub.f32 %v2429_v15, %v2436_v51 }
 0x84d   :  { %2438 = vst.msk [vmem:[%s3488_s4] sm:$0xff] %vm2425_vm11, %v2437_v43 }
 0x84e   :  { %2443 = vsyncpa [#allocation4], 1 }
 0x84f   :  { %2444 = vsyncpa [#allocation6], 1 }
 0x850   :  { %2445 = vsyncpa [#allocation9], 1 }

</bundles_post_ra>
